<compile_context>
chip_gen: v5e
topology: v5e:2x2
jax: 0.10.0
libtpu: 0.0.40
codegen_flags: <defaults>
</compile_context>

<pallas_src>
import functools
import math

import jax
import jax.numpy as jnp
from jax.experimental import pallas as pl
from jax.experimental.pallas import tpu as pltpu

LN_EPS = 1e-5
LANE = 128


# ---------------------------------------------------------------------------
# Kernel
#
# Packed parameter layout (Dp = D rounded up to a multiple of 128):
#   ws : (5, Dp, Dp)  singles (each has a distinct LHS):
#        0 enc_audio, 1 enc_visual, 2 Gate1_x2, 3 Gate2_x1, 4 Gate2_x2
#   wt : (Dp, 3Dp)    text LHS:    [Q_ta | Q_tv | Gate1_x1]   (Q pre-scaled)
#   wa : (Dp, 3Dp)    aud_al LHS:  [K_ta | V_ta | Q_av]       (Q pre-scaled)
#   wv : (Dp, 4Dp)    vis_al LHS:  [K_tv | V_tv | K_av | V_av]
#   b  : (13, Dp) f32 biases: 0 enc_a, 1 enc_v, 2 q_ta, 3 q_tv, 4 gate1,
#        5 k_ta, 6 v_ta, 7 q_av, 8 k_tv, 9 v_tv, 10 k_av, 11 v_av, 12 gate2
#   ln : (8, Dp)  f32 layernorm params: (enc_a g,b)(enc_v g,b)(norm1 g,b)(norm2 g,b)
#   mw : (3,)     f32 softmax-ed modality weights, lives in SMEM
# Activations are a 2-D slab (R, Dp) with R = batch_tile * S; reshaped to
# (batch_tile, S, Dp) only for the batched attention contractions.
# ---------------------------------------------------------------------------
def fusion_kernel(ws_ref, wt_ref, wa_ref, wv_ref, b_ref, ln_ref, mw_ref,
                  t_ref, v_ref, a_ref, o_ref, *, seq_len, d_true):
    R, Dp = t_ref.shape
    bt = R // seq_len                 # fused batch elements in this block
    mm = ws_ref.dtype                 # matmul operand dtype (bf16 or f32)
    inv_d = 1.0 / float(d_true)       # LN normalizer over the *true* feature dim

    # Inputs already arrive in the matmul dtype (bf16 fast path).  The f32
    # copy of `text` below is the single hoisted upcast used by elementwise math.
    text_mm = t_ref[...]
    vis_mm = v_ref[...]
    aud_mm = a_ref[...]
    text = text_mm.astype(jnp.float32)

    b = b_ref[...]                    # (13, Dp) f32
    ln = ln_ref[...]                  # (8, Dp)  f32

    def mdot(x_mm, w):                # MXU matmul, f32 accumulation
        return jnp.dot(x_mm, w, preferred_element_type=jnp.float32)

    def layernorm(x, gi, bi):
        # One-pass stats normalized by the true D (padded lanes are zero and
        # contribute nothing); clamp guards against E[x^2]-mu^2 cancellation.
        mu = jnp.sum(x, axis=-1, keepdims=True) * inv_d
        var = jnp.sum(x * x, axis=-1, keepdims=True) * inv_d - mu * mu
        var = jnp.maximum(var, 0.0)
        xn = (x - mu) * jax.lax.rsqrt(var + LN_EPS)
        return xn * ln[gi:gi + 1, :] + ln[bi:bi + 1, :]

    # Modality encoders: Linear -> LayerNorm -> ReLU (Dropout = eval identity).
    aud_al = jnp.maximum(layernorm(mdot(aud_mm, ws_ref[0]) + b[0:1, :], 0, 1), 0.0)
    vis_al = jnp.maximum(layernorm(mdot(vis_mm, ws_ref[1]) + b[1:2, :], 2, 3), 0.0)
    aud_al_mm = aud_al.astype(mm)     # hoisted: cast each activation once
    vis_al_mm = vis_al.astype(mm)

    # Wide shared-LHS projections (one MXU pass per activation).
    yt = mdot(text_mm, wt_ref[...])     # (R, 3Dp): [Q_ta | Q_tv | Gate1_x1]
    ya = mdot(aud_al_mm, wa_ref[...])   # (R, 3Dp): [K_ta | V_ta | Q_av]
    yv = mdot(vis_al_mm, wv_ref[...])   # (R, 4Dp): [K_tv | V_tv | K_av | V_av]

    def col(y, j):                      # lane-aligned Dp-wide column slice
        return y[:, j * Dp:(j + 1) * Dp]

    def attention(q, k, v):
        # Q pre-scaled by D^-0.5 at pack time; batched contraction on Dp
        # (no materialized transpose); softmax denom via approx EUP reciprocal.
        q3 = q.reshape(bt, seq_len, Dp).astype(mm)
        k3 = k.reshape(bt, seq_len, Dp).astype(mm)
        v3 = v.reshape(bt, seq_len, Dp).astype(mm)
        s = jnp.einsum("bqd,bkd->bqk", q3, k3,
                       preferred_element_type=jnp.float32)
        s = s - jnp.max(s, axis=-1, keepdims=True)
        p = jnp.exp(s)
        p = p * pl.reciprocal(jnp.sum(p, axis=-1, keepdims=True), approx=True)
        o = jnp.einsum("bqk,bkd->bqd", p.astype(mm), v3,
                       preferred_element_type=jnp.float32)
        return o.reshape(R, Dp)

    text_audio = attention(col(yt, 0) + b[2:3, :],
                           col(ya, 0) + b[5:6, :],
                           col(ya, 1) + b[6:7, :])
    text_visual = attention(col(yt, 1) + b[3:4, :],
                            col(yv, 0) + b[8:9, :],
                            col(yv, 1) + b[9:10, :])
    audio_visual = attention(col(ya, 2) + b[7:8, :],
                             col(yv, 2) + b[10:11, :],
                             col(yv, 3) + b[11:12, :])

    # Gated fusion: g = sigmoid(x1@Gx1 + x2@Gx2 + bg);  blend = x2 + g*(x1-x2).
    g1 = jax.nn.sigmoid(col(yt, 2) + b[4:5, :]
                        + mdot(text_audio.astype(mm), ws_ref[2]))
    fusion1 = layernorm(text_audio + g1 * (text - text_audio), 4, 5)

    g2 = jax.nn.sigmoid(mdot(fusion1.astype(mm), ws_ref[3]) + b[12:13, :]
                        + mdot(text_visual.astype(mm), ws_ref[4]))
    fusion2 = layernorm(text_visual + g2 * (fusion1 - text_visual), 6, 7)

    out = (mw_ref[0] * fusion2 + mw_ref[1] * text_audio
           + mw_ref[2] * audio_visual + text)
    o_ref[...] = out.astype(o_ref.dtype)


# ---------------------------------------------------------------------------
# Wrapper helpers
# ---------------------------------------------------------------------------
def _round_up(x, m):
    return (x + m - 1) // m * m


def _vmem_capacity_bytes():
    try:
        return int(pltpu.get_tpu_info().vmem_capacity_bytes)
    except Exception:
        return 64 * 2**20          # conservative: v7x per-TensorCore VMEM


def _const_spec(shape):
    ndim = len(shape)
    index_map = lambda i: (0,) * ndim
    try:
        # Grid-invariant params: single-buffer to halve their VMEM footprint.
        return pl.BlockSpec(shape, index_map, pipeline_mode=pl.Buffered(1))
    except Exception:
        return pl.BlockSpec(shape, index_map)


def _pick_batch_tile(B, S, Dp, mm_itemsize, vmem_cap):
    """Largest batch tile whose working set fits a VMEM budget, with
    (bt * S) % 8 == 0 (sublane-aligned blocks) and grid >= 2 when B >= 2."""
    # ~26 live f32 (R,Dp)-equivalents (incl. the 10*Dp-wide projections) plus
    # double-buffered input/output slabs.
    bytes_per_row = Dp * (26 * 4 + 2 * (3 * mm_itemsize + 4))
    weight_bytes = 15 * Dp * Dp * mm_itemsize           # single-buffered params
    budget = max(int(0.6 * vmem_cap) - weight_bytes, bytes_per_row * S)
    bt_max = max(1, min(B, (budget // bytes_per_row) // S))
    if B >= 2:
        bt_max = min(bt_max, B // 2)   # >= 2 grid steps: megacore + pipelining
    m = 8 // math.gcd(S, 8)            # smallest bt with (bt*S) % 8 == 0
    return max(m, (bt_max // m) * m)


# ---------------------------------------------------------------------------
# Wrapper
# ---------------------------------------------------------------------------
def multimodal_fusion(params, text, visual, audio, *,
                      matmul_dtype=jnp.bfloat16, batch_tile=None):
    """batch_tile (if given) must satisfy (batch_tile * S) % 8 == 0."""
    W, GW, Bv, LN, mod_w = params
    B, S, D = text.shape
    Dp = _round_up(D, LANE)            # lane-dense feature dim
    scale = float(D) ** -0.5
    mm_itemsize = jnp.dtype(matmul_dtype).itemsize

    # ---- pack parameters (zero-padded to Dp; attention scale folded into Q) --
    def pad_w(w):
        return jnp.pad(w, ((0, Dp - D), (0, Dp - D)))

    def pad_v(v):
        return jnp.pad(v, ((0, Dp - D),))

    # Singles (distinct LHS each): enc_a, enc_v, Gate1_x2, Gate2_x1, Gate2_x2.
    ws = jnp.stack([pad_w(W[0]), pad_w(W[1]), pad_w(GW[0][D:, :]),
                    pad_w(GW[1][:D, :]), pad_w(GW[1][D:, :])], axis=0)
    # Wide shared-LHS stacks.
    wt = jnp.concatenate([pad_w(W[2] * scale), pad_w(W[5] * scale),
                          pad_w(GW[0][:D, :])], axis=1)          # (Dp, 3Dp)
    wa = jnp.concatenate([pad_w(W[3]), pad_w(W[4]),
                          pad_w(W[8] * scale)], axis=1)          # (Dp, 3Dp)
    wv = jnp.concatenate([pad_w(W[6]), pad_w(W[7]),
                          pad_w(W[9]), pad_w(W[10])], axis=1)    # (Dp, 4Dp)
    ws, wt, wa, wv = (x.astype(matmul_dtype) for x in (ws, wt, wa, wv))

    bias = jnp.stack([
        pad_v(Bv[0]), pad_v(Bv[1]),                                   # encoders
        pad_v(Bv[2] * scale), pad_v(Bv[5] * scale), pad_v(Bv[11]),    # text wide
        pad_v(Bv[3]), pad_v(Bv[4]), pad_v(Bv[8] * scale),             # aud_al wide
        pad_v(Bv[6]), pad_v(Bv[7]), pad_v(Bv[9]), pad_v(Bv[10]),      # vis_al wide
        pad_v(Bv[12]),                                                # gate2
    ], axis=0).astype(jnp.float32)                                    # (13, Dp)
    ln = jnp.pad(LN, ((0, 0), (0, Dp - D))).astype(jnp.float32)       # (8, Dp)
    mw_soft = jax.nn.softmax(mod_w).astype(jnp.float32)               # (3,)

    # ---- batch-fused blocking (zero-pad batch to a multiple of the tile) -----
    vmem_cap = _vmem_capacity_bytes()
    bt = batch_tile if batch_tile is not None else _pick_batch_tile(
        B, S, Dp, mm_itemsize, vmem_cap)
    B_pad = _round_up(B, bt)
    grid = (B_pad // bt,)
    R = bt * S

    def prep(x):
        x = jnp.pad(x, ((0, B_pad - B), (0, 0), (0, Dp - D)))
        return x.reshape(B_pad * S, Dp).astype(matmul_dtype)   # bf16 activation I/O

    t2, v2, a2 = prep(text), prep(visual), prep(audio)

    x_spec = pl.BlockSpec((R, Dp), lambda i: (i, 0))
    in_specs = [_const_spec(ws.shape), _const_spec(wt.shape),
                _const_spec(wa.shape), _const_spec(wv.shape),
                _const_spec(bias.shape), _const_spec(ln.shape),
                pl.BlockSpec(memory_space=pltpu.MemorySpace.SMEM),
                x_spec, x_spec, x_spec]

    # Advisory cost estimate so XLA can schedule neighbors around this call.
    N = B_pad * S
    flops = 2 * N * Dp * Dp * 15 + 12 * N * S * Dp
    transcendentals = 3 * N * S + 2 * N * Dp + 4 * N
    param_bytes = ((ws.size + wt.size + wa.size + wv.size) * mm_itemsize
                   + (bias.size + ln.size) * 4)
    bytes_accessed = param_bytes + 3 * N * Dp * mm_itemsize + N * Dp * 4

    out2 = pl.pallas_call(
        functools.partial(fusion_kernel, seq_len=S, d_true=D),
        out_shape=jax.ShapeDtypeStruct((B_pad * S, Dp), jnp.float32),
        grid=grid,
        in_specs=in_specs,
        out_specs=x_spec,
        compiler_params=pltpu.CompilerParams(
            dimension_semantics=("parallel",),
            vmem_limit_bytes=int(0.85 * vmem_cap)),
        cost_estimate=pl.CostEstimate(flops=flops,
                                      transcendentals=transcendentals,
                                      bytes_accessed=bytes_accessed),
    )(ws, wt, wa, wv, bias, ln, mw_soft, t2, v2, a2)

    return out2.reshape(B_pad, S, Dp)[:B, :, :D]


# ---------------------------------------------------------------------------
# Pure-JAX reference (for self-check)
# ---------------------------------------------------------------------------
def reference(params, text, visual, audio):
    W, GW, Bv, LN, mod_w = params

    def linear(x, wi, bi):
        return x @ W[wi] + Bv[bi]

    def layernorm(x, gi, bi):
        mu = jnp.mean(x, axis=-1, keepdims=True)
        var = jnp.mean((x - mu) ** 2, axis=-1, keepdims=True)
        return (x - mu) / jnp.sqrt(var + LN_EPS) * LN[gi] + LN[bi]

    def encoder(x, wi, bi, gi, bei):
        return jax.nn.relu(layernorm(linear(x, wi, bi), gi, bei))

    def cross_attn(x1, x2, wb, bb):
        D = x1.shape[-1]
        q = linear(x1, wb, bb)
        k = linear(x2, wb + 1, bb + 1)
        v = linear(x2, wb + 2, bb + 2)
        attn = jax.nn.softmax(q @ jnp.swapaxes(k, -2, -1) * D ** -0.5, axis=-1)
        return attn @ v

    def gated(x1, x2, gi, bi):
        g = jax.nn.sigmoid(jnp.concatenate([x1, x2], -1) @ GW[gi] + Bv[bi])
        return g * x1 + (1 - g) * x2

    aud_al = encoder(audio, 0, 0, 0, 1)
    vis_al = encoder(visual, 1, 1, 2, 3)
    ta = cross_attn(text, aud_al, 2, 2)
    tv = cross_attn(text, vis_al, 5, 5)
    av = cross_attn(aud_al, vis_al, 8, 8)
    w = jax.nn.softmax(mod_w)
    f1 = layernorm(gated(text, ta, 0, 11), 4, 5)
    f2 = layernorm(gated(f1, tv, 1, 12), 6, 7)
    return w[0] * f2 + w[1] * ta + w[2] * av + text


# ---------------------------------------------------------------------------
def make_params(key, D):
    ks = jax.random.split(key, 6)
    W = jax.random.normal(ks[0], (11, D, D), jnp.float32) * (1.0 / jnp.sqrt(D))
    GW = jax.random.normal(ks[1], (2, 2 * D, D), jnp.float32) * (1.0 / jnp.sqrt(2 * D))
    Bv = jax.random.normal(ks[2], (13, D), jnp.float32) * 0.02
    gammas = jnp.ones((4, D), jnp.float32)
    betas = jnp.zeros((4, D), jnp.float32)
    LN = jnp.stack([gammas[0], betas[0], gammas[1], betas[1],
                    gammas[2], betas[2], gammas[3], betas[3]], axis=0)
    mod_w = jnp.ones((3,), jnp.float32)   # nn.Parameter(torch.ones(3))
    return (W, GW, Bv, LN, mod_w)


if __name__ == "__main__":
    B, S, D = 2, 8, 32
    key = jax.random.PRNGKey(0)
    k_p, k_t, k_v, k_a = jax.random.split(key, 4)
    params = make_params(k_p, D)
    text = jax.random.normal(k_t, (B, S, D), jnp.float32)
    visual = jax.random.normal(k_v, (B, S, D), jnp.float32)
    audio = jax.random.normal(k_a, (B, S, D), jnp.float32)

    ref = reference(params, text, visual, audio)

    # f32 matmul/validation path (tight tolerance).
    out_f32 = jax.block_until_ready(
        multimodal_fusion(params, text, visual, audio,
                          matmul_dtype=jnp.float32))
    assert out_f32.shape == (B, S, D)
    assert jnp.allclose(out_f32, ref, atol=3e-3, rtol=3e-3), "f32 mismatch"

    # bf16-operand / bf16-I/O MXU fast path (production default).
    out_bf16 = jax.block_until_ready(
        multimodal_fusion(params, text, visual, audio))
    assert jnp.allclose(out_bf16, ref, atol=6e-2, rtol=6e-2), "bf16 mismatch"

    # Second shape exercising batch tiling (bt = 2, grid = 2).
    B2 = 4
    text2 = jax.random.normal(k_t, (B2, S, D), jnp.float32)
    visual2 = jax.random.normal(k_v, (B2, S, D), jnp.float32)
    audio2 = jax.random.normal(k_a, (B2, S, D), jnp.float32)
    ref2 = reference(params, text2, visual2, audio2)
    out_tiled = jax.block_until_ready(
        multimodal_fusion(params, text2, visual2, audio2))
    assert jnp.allclose(out_tiled, ref2, atol=6e-2, rtol=6e-2), "tiled mismatch"

    print("KERNEL_OK")
</pallas_src>

<mosaic_0001>
module attributes {stable_mosaic.version = 11 : i64} {
  func.func @fusion_kernel(%arg0: i32, %arg1: memref<5x128x128xf32, #tpu.memory_space<vmem>>, %arg2: memref<128x384xf32, #tpu.memory_space<vmem>>, %arg3: memref<128x384xf32, #tpu.memory_space<vmem>>, %arg4: memref<128x512xf32, #tpu.memory_space<vmem>>, %arg5: memref<13x128xf32, #tpu.memory_space<vmem>>, %arg6: memref<8x128xf32, #tpu.memory_space<vmem>>, %arg7: memref<3xf32, #tpu.memory_space<smem>>, %arg8: memref<8x128xf32, #tpu.memory_space<vmem>>, %arg9: memref<8x128xf32, #tpu.memory_space<vmem>>, %arg10: memref<8x128xf32, #tpu.memory_space<vmem>>, %arg11: memref<8x128xf32, #tpu.memory_space<vmem>>) attributes {dimension_semantics = [#tpu.dimension_semantics<parallel>], iteration_bounds = array<i64: 2>, scalar_prefetch = 0 : i64, scratch_operands = 0 : i64, tpu.core_type = #tpu.core_type<tc>, window_params = [{pipeline_mode = #tpu.pipeline_mode<synchronous>, transform_indices = @transform_0, window_bounds = array<i64: 5, 128, 128>}, {pipeline_mode = #tpu.pipeline_mode<synchronous>, transform_indices = @transform_1, window_bounds = array<i64: 128, 384>}, {pipeline_mode = #tpu.pipeline_mode<synchronous>, transform_indices = @transform_2, window_bounds = array<i64: 128, 384>}, {pipeline_mode = #tpu.pipeline_mode<synchronous>, transform_indices = @transform_3, window_bounds = array<i64: 128, 512>}, {pipeline_mode = #tpu.pipeline_mode<synchronous>, transform_indices = @transform_4, window_bounds = array<i64: 13, 128>}, {pipeline_mode = #tpu.pipeline_mode<synchronous>, transform_indices = @transform_5, window_bounds = array<i64: 8, 128>}, {transform_indices = @transform_6, window_bounds = array<i64: 3>}, {transform_indices = @transform_7, window_bounds = array<i64: 8, 128>}, {transform_indices = @transform_8, window_bounds = array<i64: 8, 128>}, {transform_indices = @transform_9, window_bounds = array<i64: 8, 128>}, {transform_indices = @transform_10, window_bounds = array<i64: 8, 128>}]} {
    %c0 = arith.constant 0 : index
    %c0_0 = arith.constant 0 : index
    %0 = vector.load %arg8[%c0, %c0_0] : memref<8x128xf32, #tpu.memory_space<vmem>>, vector<8x128xf32>
    %c0_1 = arith.constant 0 : index
    %c0_2 = arith.constant 0 : index
    %1 = vector.load %arg9[%c0_1, %c0_2] : memref<8x128xf32, #tpu.memory_space<vmem>>, vector<8x128xf32>
    %c0_3 = arith.constant 0 : index
    %c0_4 = arith.constant 0 : index
    %2 = vector.load %arg10[%c0_3, %c0_4] : memref<8x128xf32, #tpu.memory_space<vmem>>, vector<8x128xf32>
    %c0_5 = arith.constant 0 : index
    %c0_6 = arith.constant 0 : index
    %3 = vector.load %arg5[%c0_5, %c0_6] : memref<13x128xf32, #tpu.memory_space<vmem>>, vector<13x128xf32>
    %c0_7 = arith.constant 0 : index
    %c0_8 = arith.constant 0 : index
    %4 = vector.load %arg6[%c0_7, %c0_8] : memref<8x128xf32, #tpu.memory_space<vmem>>, vector<8x128xf32>
    %c0_9 = arith.constant 0 : index
    %c0_10 = arith.constant 0 : index
    %c0_11 = arith.constant 0 : index
    %5 = vector.load %arg1[%c0_9, %c0_10, %c0_11] : memref<5x128x128xf32, #tpu.memory_space<vmem>>, vector<1x128x128xf32>
    %6 = vector.shape_cast %5 : vector<1x128x128xf32> to vector<128x128xf32>
    %cst = arith.constant dense<0.000000e+00> : vector<8x128xf32>
    %7 = tpu.matmul %2, %6, %cst {dimension_numbers = #tpu.dot_dimension_numbers<[1], [0], [0], [1], [0, 0, 1, 1], [], []>} : vector<8x128xf32>, vector<128x128xf32>, vector<8x128xf32> -> vector<8x128xf32>
    %8 = vector.extract_strided_slice %3 {offsets = [0, 0], sizes = [1, 128], strides = [1, 1]} : vector<13x128xf32> to vector<1x128xf32>
    %9 = vector.broadcast %8 : vector<1x128xf32> to vector<8x128xf32>
    %10 = arith.addf %7, %9 : vector<8x128xf32>
    %cst_12 = arith.constant dense<0.000000e+00> : vector<8xf32>
    %11 = vector.multi_reduction <add>, %10, %cst_12 [1] : vector<8x128xf32> to vector<8xf32>
    %12 = vector.shape_cast %11 : vector<8xf32> to vector<8x1xf32>
    %cst_13 = arith.constant 3.125000e-02 : f32
    %13 = vector.broadcast %cst_13 : f32 to vector<8x1xf32>
    %14 = arith.mulf %12, %13 : vector<8x1xf32>
    %15 = arith.mulf %10, %10 : vector<8x128xf32>
    %cst_14 = arith.constant dense<0.000000e+00> : vector<8xf32>
    %16 = vector.multi_reduction <add>, %15, %cst_14 [1] : vector<8x128xf32> to vector<8xf32>
    %17 = vector.shape_cast %16 : vector<8xf32> to vector<8x1xf32>
    %cst_15 = arith.constant 3.125000e-02 : f32
    %18 = vector.broadcast %cst_15 : f32 to vector<8x1xf32>
    %19 = arith.mulf %17, %18 : vector<8x1xf32>
    %20 = arith.mulf %14, %14 : vector<8x1xf32>
    %21 = arith.subf %19, %20 : vector<8x1xf32>
    %cst_16 = arith.constant 0.000000e+00 : f32
    %22 = vector.broadcast %cst_16 : f32 to vector<8x1xf32>
    %23 = arith.maximumf %21, %22 : vector<8x1xf32>
    %24 = vector.broadcast %14 : vector<8x1xf32> to vector<8x128xf32>
    %25 = arith.subf %10, %24 : vector<8x128xf32>
    %cst_17 = arith.constant 9.99999974E-6 : f32
    %26 = vector.broadcast %cst_17 : f32 to vector<8x1xf32>
    %27 = arith.addf %23, %26 : vector<8x1xf32>
    %28 = math.rsqrt %27 : vector<8x1xf32>
    %29 = vector.broadcast %28 : vector<8x1xf32> to vector<8x128xf32>
    %30 = arith.mulf %25, %29 : vector<8x128xf32>
    %31 = vector.extract_strided_slice %4 {offsets = [0, 0], sizes = [1, 128], strides = [1, 1]} : vector<8x128xf32> to vector<1x128xf32>
    %32 = vector.broadcast %31 : vector<1x128xf32> to vector<8x128xf32>
    %33 = arith.mulf %30, %32 : vector<8x128xf32>
    %34 = vector.extract_strided_slice %4 {offsets = [1, 0], sizes = [1, 128], strides = [1, 1]} : vector<8x128xf32> to vector<1x128xf32>
    %35 = vector.broadcast %34 : vector<1x128xf32> to vector<8x128xf32>
    %36 = arith.addf %33, %35 : vector<8x128xf32>
    %cst_18 = arith.constant 0.000000e+00 : f32
    %37 = vector.broadcast %cst_18 : f32 to vector<8x128xf32>
    %38 = arith.maximumf %36, %37 : vector<8x128xf32>
    %c1 = arith.constant 1 : index
    %c0_19 = arith.constant 0 : index
    %c0_20 = arith.constant 0 : index
    %39 = vector.load %arg1[%c1, %c0_19, %c0_20] : memref<5x128x128xf32, #tpu.memory_space<vmem>>, vector<1x128x128xf32>
    %40 = vector.shape_cast %39 : vector<1x128x128xf32> to vector<128x128xf32>
    %cst_21 = arith.constant dense<0.000000e+00> : vector<8x128xf32>
    %41 = tpu.matmul %1, %40, %cst_21 {dimension_numbers = #tpu.dot_dimension_numbers<[1], [0], [0], [1], [0, 0, 1, 1], [], []>} : vector<8x128xf32>, vector<128x128xf32>, vector<8x128xf32> -> vector<8x128xf32>
    %42 = vector.extract_strided_slice %3 {offsets = [1, 0], sizes = [1, 128], strides = [1, 1]} : vector<13x128xf32> to vector<1x128xf32>
    %43 = vector.broadcast %42 : vector<1x128xf32> to vector<8x128xf32>
    %44 = arith.addf %41, %43 : vector<8x128xf32>
    %cst_22 = arith.constant dense<0.000000e+00> : vector<8xf32>
    %45 = vector.multi_reduction <add>, %44, %cst_22 [1] : vector<8x128xf32> to vector<8xf32>
    %46 = vector.shape_cast %45 : vector<8xf32> to vector<8x1xf32>
    %cst_23 = arith.constant 3.125000e-02 : f32
    %47 = vector.broadcast %cst_23 : f32 to vector<8x1xf32>
    %48 = arith.mulf %46, %47 : vector<8x1xf32>
    %49 = arith.mulf %44, %44 : vector<8x128xf32>
    %cst_24 = arith.constant dense<0.000000e+00> : vector<8xf32>
    %50 = vector.multi_reduction <add>, %49, %cst_24 [1] : vector<8x128xf32> to vector<8xf32>
    %51 = vector.shape_cast %50 : vector<8xf32> to vector<8x1xf32>
    %cst_25 = arith.constant 3.125000e-02 : f32
    %52 = vector.broadcast %cst_25 : f32 to vector<8x1xf32>
    %53 = arith.mulf %51, %52 : vector<8x1xf32>
    %54 = arith.mulf %48, %48 : vector<8x1xf32>
    %55 = arith.subf %53, %54 : vector<8x1xf32>
    %cst_26 = arith.constant 0.000000e+00 : f32
    %56 = vector.broadcast %cst_26 : f32 to vector<8x1xf32>
    %57 = arith.maximumf %55, %56 : vector<8x1xf32>
    %58 = vector.broadcast %48 : vector<8x1xf32> to vector<8x128xf32>
    %59 = arith.subf %44, %58 : vector<8x128xf32>
    %cst_27 = arith.constant 9.99999974E-6 : f32
    %60 = vector.broadcast %cst_27 : f32 to vector<8x1xf32>
    %61 = arith.addf %57, %60 : vector<8x1xf32>
    %62 = math.rsqrt %61 : vector<8x1xf32>
    %63 = vector.broadcast %62 : vector<8x1xf32> to vector<8x128xf32>
    %64 = arith.mulf %59, %63 : vector<8x128xf32>
    %65 = vector.extract_strided_slice %4 {offsets = [2, 0], sizes = [1, 128], strides = [1, 1]} : vector<8x128xf32> to vector<1x128xf32>
    %66 = vector.broadcast %65 : vector<1x128xf32> to vector<8x128xf32>
    %67 = arith.mulf %64, %66 : vector<8x128xf32>
    %68 = vector.extract_strided_slice %4 {offsets = [3, 0], sizes = [1, 128], strides = [1, 1]} : vector<8x128xf32> to vector<1x128xf32>
    %69 = vector.broadcast %68 : vector<1x128xf32> to vector<8x128xf32>
    %70 = arith.addf %67, %69 : vector<8x128xf32>
    %cst_28 = arith.constant 0.000000e+00 : f32
    %71 = vector.broadcast %cst_28 : f32 to vector<8x128xf32>
    %72 = arith.maximumf %70, %71 : vector<8x128xf32>
    %c0_29 = arith.constant 0 : index
    %c0_30 = arith.constant 0 : index
    %73 = vector.load %arg2[%c0_29, %c0_30] : memref<128x384xf32, #tpu.memory_space<vmem>>, vector<128x384xf32>
    %cst_31 = arith.constant dense<0.000000e+00> : vector<8x384xf32>
    %74 = tpu.matmul %0, %73, %cst_31 {dimension_numbers = #tpu.dot_dimension_numbers<[1], [0], [0], [1], [0, 0, 1, 1], [], []>} : vector<8x128xf32>, vector<128x384xf32>, vector<8x384xf32> -> vector<8x384xf32>
    %c0_32 = arith.constant 0 : index
    %c0_33 = arith.constant 0 : index
    %75 = vector.load %arg3[%c0_32, %c0_33] : memref<128x384xf32, #tpu.memory_space<vmem>>, vector<128x384xf32>
    %cst_34 = arith.constant dense<0.000000e+00> : vector<8x384xf32>
    %76 = tpu.matmul %38, %75, %cst_34 {dimension_numbers = #tpu.dot_dimension_numbers<[1], [0], [0], [1], [0, 0, 1, 1], [], []>} : vector<8x128xf32>, vector<128x384xf32>, vector<8x384xf32> -> vector<8x384xf32>
    %c0_35 = arith.constant 0 : index
    %c0_36 = arith.constant 0 : index
    %77 = vector.load %arg4[%c0_35, %c0_36] : memref<128x512xf32, #tpu.memory_space<vmem>>, vector<128x512xf32>
    %cst_37 = arith.constant dense<0.000000e+00> : vector<8x512xf32>
    %78 = tpu.matmul %72, %77, %cst_37 {dimension_numbers = #tpu.dot_dimension_numbers<[1], [0], [0], [1], [0, 0, 1, 1], [], []>} : vector<8x128xf32>, vector<128x512xf32>, vector<8x512xf32> -> vector<8x512xf32>
    %79 = vector.extract_strided_slice %74 {offsets = [0, 0], sizes = [8, 128], strides = [1, 1]} : vector<8x384xf32> to vector<8x128xf32>
    %80 = vector.extract_strided_slice %3 {offsets = [2, 0], sizes = [1, 128], strides = [1, 1]} : vector<13x128xf32> to vector<1x128xf32>
    %81 = vector.broadcast %80 : vector<1x128xf32> to vector<8x128xf32>
    %82 = arith.addf %79, %81 : vector<8x128xf32>
    %83 = vector.extract_strided_slice %76 {offsets = [0, 0], sizes = [8, 128], strides = [1, 1]} : vector<8x384xf32> to vector<8x128xf32>
    %84 = vector.extract_strided_slice %3 {offsets = [5, 0], sizes = [1, 128], strides = [1, 1]} : vector<13x128xf32> to vector<1x128xf32>
    %85 = vector.broadcast %84 : vector<1x128xf32> to vector<8x128xf32>
    %86 = arith.addf %83, %85 : vector<8x128xf32>
    %87 = vector.extract_strided_slice %76 {offsets = [0, 128], sizes = [8, 128], strides = [1, 1]} : vector<8x384xf32> to vector<8x128xf32>
    %88 = vector.extract_strided_slice %3 {offsets = [6, 0], sizes = [1, 128], strides = [1, 1]} : vector<13x128xf32> to vector<1x128xf32>
    %89 = vector.broadcast %88 : vector<1x128xf32> to vector<8x128xf32>
    %90 = arith.addf %87, %89 : vector<8x128xf32>
    %91 = vector.shape_cast %82 : vector<8x128xf32> to vector<1x8x128xf32>
    %92 = vector.shape_cast %86 : vector<8x128xf32> to vector<1x8x128xf32>
    %93 = vector.shape_cast %90 : vector<8x128xf32> to vector<1x8x128xf32>
    "tpu.trace_start"() <{level = 10 : i32, message = "bqd,bkd->bqk"}> : () -> ()
    %cst_38 = arith.constant dense<0.000000e+00> : vector<1x8x8xf32>
    %94 = tpu.matmul %91, %92, %cst_38 {dimension_numbers = #tpu.dot_dimension_numbers<[2], [2], [1], [1], [0, 0, 0, 1, 1, 1], [0], [0]>} : vector<1x8x128xf32>, vector<1x8x128xf32>, vector<1x8x8xf32> -> vector<1x8x8xf32>
    "tpu.trace_stop"() : () -> ()
    %cst_39 = arith.constant dense<0xFF800000> : vector<1x8xf32>
    %95 = vector.multi_reduction <maximumf>, %94, %cst_39 [2] : vector<1x8x8xf32> to vector<1x8xf32>
    %96 = vector.shape_cast %95 : vector<1x8xf32> to vector<1x8x1xf32>
    %97 = vector.broadcast %96 : vector<1x8x1xf32> to vector<1x8x8xf32>
    %98 = arith.subf %94, %97 : vector<1x8x8xf32>
    %99 = math.exp %98 : vector<1x8x8xf32>
    %cst_40 = arith.constant dense<0.000000e+00> : vector<1x8xf32>
    %100 = vector.multi_reduction <add>, %99, %cst_40 [2] : vector<1x8x8xf32> to vector<1x8xf32>
    %101 = vector.shape_cast %100 : vector<1x8xf32> to vector<1x8x1xf32>
    %102 = tpu.reciprocal %101 {approx = true} : vector<1x8x1xf32> -> vector<1x8x1xf32>
    %103 = vector.broadcast %102 : vector<1x8x1xf32> to vector<1x8x8xf32>
    %104 = arith.mulf %99, %103 : vector<1x8x8xf32>
    "tpu.trace_start"() <{level = 10 : i32, message = "bqk,bkd->bqd"}> : () -> ()
    %cst_41 = arith.constant dense<0.000000e+00> : vector<1x8x128xf32>
    %105 = tpu.matmul %104, %93, %cst_41 {dimension_numbers = #tpu.dot_dimension_numbers<[2], [1], [1], [2], [0, 0, 0, 1, 1, 2], [0], [0]>} : vector<1x8x8xf32>, vector<1x8x128xf32>, vector<1x8x128xf32> -> vector<1x8x128xf32>
    "tpu.trace_stop"() : () -> ()
    %106 = vector.shape_cast %105 : vector<1x8x128xf32> to vector<8x128xf32>
    %107 = vector.extract_strided_slice %74 {offsets = [0, 128], sizes = [8, 128], strides = [1, 1]} : vector<8x384xf32> to vector<8x128xf32>
    %108 = vector.extract_strided_slice %3 {offsets = [3, 0], sizes = [1, 128], strides = [1, 1]} : vector<13x128xf32> to vector<1x128xf32>
    %109 = vector.broadcast %108 : vector<1x128xf32> to vector<8x128xf32>
    %110 = arith.addf %107, %109 : vector<8x128xf32>
    %111 = vector.extract_strided_slice %78 {offsets = [0, 0], sizes = [8, 128], strides = [1, 1]} : vector<8x512xf32> to vector<8x128xf32>
    %112 = vector.extract_strided_slice %3 {offsets = [8, 0], sizes = [1, 128], strides = [1, 1]} : vector<13x128xf32> to vector<1x128xf32>
    %113 = vector.broadcast %112 : vector<1x128xf32> to vector<8x128xf32>
    %114 = arith.addf %111, %113 : vector<8x128xf32>
    %115 = vector.extract_strided_slice %78 {offsets = [0, 128], sizes = [8, 128], strides = [1, 1]} : vector<8x512xf32> to vector<8x128xf32>
    %116 = vector.extract_strided_slice %3 {offsets = [9, 0], sizes = [1, 128], strides = [1, 1]} : vector<13x128xf32> to vector<1x128xf32>
    %117 = vector.broadcast %116 : vector<1x128xf32> to vector<8x128xf32>
    %118 = arith.addf %115, %117 : vector<8x128xf32>
    %119 = vector.shape_cast %110 : vector<8x128xf32> to vector<1x8x128xf32>
    %120 = vector.shape_cast %114 : vector<8x128xf32> to vector<1x8x128xf32>
    %121 = vector.shape_cast %118 : vector<8x128xf32> to vector<1x8x128xf32>
    "tpu.trace_start"() <{level = 10 : i32, message = "bqd,bkd->bqk"}> : () -> ()
    %cst_42 = arith.constant dense<0.000000e+00> : vector<1x8x8xf32>
    %122 = tpu.matmul %119, %120, %cst_42 {dimension_numbers = #tpu.dot_dimension_numbers<[2], [2], [1], [1], [0, 0, 0, 1, 1, 1], [0], [0]>} : vector<1x8x128xf32>, vector<1x8x128xf32>, vector<1x8x8xf32> -> vector<1x8x8xf32>
    "tpu.trace_stop"() : () -> ()
    %cst_43 = arith.constant dense<0xFF800000> : vector<1x8xf32>
    %123 = vector.multi_reduction <maximumf>, %122, %cst_43 [2] : vector<1x8x8xf32> to vector<1x8xf32>
    %124 = vector.shape_cast %123 : vector<1x8xf32> to vector<1x8x1xf32>
    %125 = vector.broadcast %124 : vector<1x8x1xf32> to vector<1x8x8xf32>
    %126 = arith.subf %122, %125 : vector<1x8x8xf32>
    %127 = math.exp %126 : vector<1x8x8xf32>
    %cst_44 = arith.constant dense<0.000000e+00> : vector<1x8xf32>
    %128 = vector.multi_reduction <add>, %127, %cst_44 [2] : vector<1x8x8xf32> to vector<1x8xf32>
    %129 = vector.shape_cast %128 : vector<1x8xf32> to vector<1x8x1xf32>
    %130 = tpu.reciprocal %129 {approx = true} : vector<1x8x1xf32> -> vector<1x8x1xf32>
    %131 = vector.broadcast %130 : vector<1x8x1xf32> to vector<1x8x8xf32>
    %132 = arith.mulf %127, %131 : vector<1x8x8xf32>
    "tpu.trace_start"() <{level = 10 : i32, message = "bqk,bkd->bqd"}> : () -> ()
    %cst_45 = arith.constant dense<0.000000e+00> : vector<1x8x128xf32>
    %133 = tpu.matmul %132, %121, %cst_45 {dimension_numbers = #tpu.dot_dimension_numbers<[2], [1], [1], [2], [0, 0, 0, 1, 1, 2], [0], [0]>} : vector<1x8x8xf32>, vector<1x8x128xf32>, vector<1x8x128xf32> -> vector<1x8x128xf32>
    "tpu.trace_stop"() : () -> ()
    %134 = vector.shape_cast %133 : vector<1x8x128xf32> to vector<8x128xf32>
    %135 = vector.extract_strided_slice %76 {offsets = [0, 256], sizes = [8, 128], strides = [1, 1]} : vector<8x384xf32> to vector<8x128xf32>
    %136 = vector.extract_strided_slice %3 {offsets = [7, 0], sizes = [1, 128], strides = [1, 1]} : vector<13x128xf32> to vector<1x128xf32>
    %137 = vector.broadcast %136 : vector<1x128xf32> to vector<8x128xf32>
    %138 = arith.addf %135, %137 : vector<8x128xf32>
    %139 = vector.extract_strided_slice %78 {offsets = [0, 256], sizes = [8, 128], strides = [1, 1]} : vector<8x512xf32> to vector<8x128xf32>
    %140 = vector.extract_strided_slice %3 {offsets = [10, 0], sizes = [1, 128], strides = [1, 1]} : vector<13x128xf32> to vector<1x128xf32>
    %141 = vector.broadcast %140 : vector<1x128xf32> to vector<8x128xf32>
    %142 = arith.addf %139, %141 : vector<8x128xf32>
    %143 = vector.extract_strided_slice %78 {offsets = [0, 384], sizes = [8, 128], strides = [1, 1]} : vector<8x512xf32> to vector<8x128xf32>
    %144 = vector.extract_strided_slice %3 {offsets = [11, 0], sizes = [1, 128], strides = [1, 1]} : vector<13x128xf32> to vector<1x128xf32>
    %145 = vector.broadcast %144 : vector<1x128xf32> to vector<8x128xf32>
    %146 = arith.addf %143, %145 : vector<8x128xf32>
    %147 = vector.shape_cast %138 : vector<8x128xf32> to vector<1x8x128xf32>
    %148 = vector.shape_cast %142 : vector<8x128xf32> to vector<1x8x128xf32>
    %149 = vector.shape_cast %146 : vector<8x128xf32> to vector<1x8x128xf32>
    "tpu.trace_start"() <{level = 10 : i32, message = "bqd,bkd->bqk"}> : () -> ()
    %cst_46 = arith.constant dense<0.000000e+00> : vector<1x8x8xf32>
    %150 = tpu.matmul %147, %148, %cst_46 {dimension_numbers = #tpu.dot_dimension_numbers<[2], [2], [1], [1], [0, 0, 0, 1, 1, 1], [0], [0]>} : vector<1x8x128xf32>, vector<1x8x128xf32>, vector<1x8x8xf32> -> vector<1x8x8xf32>
    "tpu.trace_stop"() : () -> ()
    %cst_47 = arith.constant dense<0xFF800000> : vector<1x8xf32>
    %151 = vector.multi_reduction <maximumf>, %150, %cst_47 [2] : vector<1x8x8xf32> to vector<1x8xf32>
    %152 = vector.shape_cast %151 : vector<1x8xf32> to vector<1x8x1xf32>
    %153 = vector.broadcast %152 : vector<1x8x1xf32> to vector<1x8x8xf32>
    %154 = arith.subf %150, %153 : vector<1x8x8xf32>
    %155 = math.exp %154 : vector<1x8x8xf32>
    %cst_48 = arith.constant dense<0.000000e+00> : vector<1x8xf32>
    %156 = vector.multi_reduction <add>, %155, %cst_48 [2] : vector<1x8x8xf32> to vector<1x8xf32>
    %157 = vector.shape_cast %156 : vector<1x8xf32> to vector<1x8x1xf32>
    %158 = tpu.reciprocal %157 {approx = true} : vector<1x8x1xf32> -> vector<1x8x1xf32>
    %159 = vector.broadcast %158 : vector<1x8x1xf32> to vector<1x8x8xf32>
    %160 = arith.mulf %155, %159 : vector<1x8x8xf32>
    "tpu.trace_start"() <{level = 10 : i32, message = "bqk,bkd->bqd"}> : () -> ()
    %cst_49 = arith.constant dense<0.000000e+00> : vector<1x8x128xf32>
    %161 = tpu.matmul %160, %149, %cst_49 {dimension_numbers = #tpu.dot_dimension_numbers<[2], [1], [1], [2], [0, 0, 0, 1, 1, 2], [0], [0]>} : vector<1x8x8xf32>, vector<1x8x128xf32>, vector<1x8x128xf32> -> vector<1x8x128xf32>
    "tpu.trace_stop"() : () -> ()
    %162 = vector.shape_cast %161 : vector<1x8x128xf32> to vector<8x128xf32>
    %163 = vector.extract_strided_slice %74 {offsets = [0, 256], sizes = [8, 128], strides = [1, 1]} : vector<8x384xf32> to vector<8x128xf32>
    %164 = vector.extract_strided_slice %3 {offsets = [4, 0], sizes = [1, 128], strides = [1, 1]} : vector<13x128xf32> to vector<1x128xf32>
    %165 = vector.broadcast %164 : vector<1x128xf32> to vector<8x128xf32>
    %166 = arith.addf %163, %165 : vector<8x128xf32>
    %c2 = arith.constant 2 : index
    %c0_50 = arith.constant 0 : index
    %c0_51 = arith.constant 0 : index
    %167 = vector.load %arg1[%c2, %c0_50, %c0_51] : memref<5x128x128xf32, #tpu.memory_space<vmem>>, vector<1x128x128xf32>
    %168 = vector.shape_cast %167 : vector<1x128x128xf32> to vector<128x128xf32>
    %cst_52 = arith.constant dense<0.000000e+00> : vector<8x128xf32>
    %169 = tpu.matmul %106, %168, %cst_52 {dimension_numbers = #tpu.dot_dimension_numbers<[1], [0], [0], [1], [0, 0, 1, 1], [], []>} : vector<8x128xf32>, vector<128x128xf32>, vector<8x128xf32> -> vector<8x128xf32>
    %170 = arith.addf %166, %169 : vector<8x128xf32>
    %171 = arith.negf %170 : vector<8x128xf32>
    %172 = math.exp %171 : vector<8x128xf32>
    %cst_53 = arith.constant 1.000000e+00 : f32
    %173 = vector.broadcast %cst_53 : f32 to vector<8x128xf32>
    %174 = arith.addf %173, %172 : vector<8x128xf32>
    %175 = arith.divf %173, %174 : vector<8x128xf32>
    %176 = arith.subf %0, %106 : vector<8x128xf32>
    %177 = arith.mulf %175, %176 : vector<8x128xf32>
    %178 = arith.addf %106, %177 : vector<8x128xf32>
    %cst_54 = arith.constant dense<0.000000e+00> : vector<8xf32>
    %179 = vector.multi_reduction <add>, %178, %cst_54 [1] : vector<8x128xf32> to vector<8xf32>
    %180 = vector.shape_cast %179 : vector<8xf32> to vector<8x1xf32>
    %cst_55 = arith.constant 3.125000e-02 : f32
    %181 = vector.broadcast %cst_55 : f32 to vector<8x1xf32>
    %182 = arith.mulf %180, %181 : vector<8x1xf32>
    %183 = arith.mulf %178, %178 : vector<8x128xf32>
    %cst_56 = arith.constant dense<0.000000e+00> : vector<8xf32>
    %184 = vector.multi_reduction <add>, %183, %cst_56 [1] : vector<8x128xf32> to vector<8xf32>
    %185 = vector.shape_cast %184 : vector<8xf32> to vector<8x1xf32>
    %cst_57 = arith.constant 3.125000e-02 : f32
    %186 = vector.broadcast %cst_57 : f32 to vector<8x1xf32>
    %187 = arith.mulf %185, %186 : vector<8x1xf32>
    %188 = arith.mulf %182, %182 : vector<8x1xf32>
    %189 = arith.subf %187, %188 : vector<8x1xf32>
    %cst_58 = arith.constant 0.000000e+00 : f32
    %190 = vector.broadcast %cst_58 : f32 to vector<8x1xf32>
    %191 = arith.maximumf %189, %190 : vector<8x1xf32>
    %192 = vector.broadcast %182 : vector<8x1xf32> to vector<8x128xf32>
    %193 = arith.subf %178, %192 : vector<8x128xf32>
    %cst_59 = arith.constant 9.99999974E-6 : f32
    %194 = vector.broadcast %cst_59 : f32 to vector<8x1xf32>
    %195 = arith.addf %191, %194 : vector<8x1xf32>
    %196 = math.rsqrt %195 : vector<8x1xf32>
    %197 = vector.broadcast %196 : vector<8x1xf32> to vector<8x128xf32>
    %198 = arith.mulf %193, %197 : vector<8x128xf32>
    %199 = vector.extract_strided_slice %4 {offsets = [4, 0], sizes = [1, 128], strides = [1, 1]} : vector<8x128xf32> to vector<1x128xf32>
    %200 = vector.broadcast %199 : vector<1x128xf32> to vector<8x128xf32>
    %201 = arith.mulf %198, %200 : vector<8x128xf32>
    %202 = vector.extract_strided_slice %4 {offsets = [5, 0], sizes = [1, 128], strides = [1, 1]} : vector<8x128xf32> to vector<1x128xf32>
    %203 = vector.broadcast %202 : vector<1x128xf32> to vector<8x128xf32>
    %204 = arith.addf %201, %203 : vector<8x128xf32>
    %c3 = arith.constant 3 : index
    %c0_60 = arith.constant 0 : index
    %c0_61 = arith.constant 0 : index
    %205 = vector.load %arg1[%c3, %c0_60, %c0_61] : memref<5x128x128xf32, #tpu.memory_space<vmem>>, vector<1x128x128xf32>
    %206 = vector.shape_cast %205 : vector<1x128x128xf32> to vector<128x128xf32>
    %cst_62 = arith.constant dense<0.000000e+00> : vector<8x128xf32>
    %207 = tpu.matmul %204, %206, %cst_62 {dimension_numbers = #tpu.dot_dimension_numbers<[1], [0], [0], [1], [0, 0, 1, 1], [], []>} : vector<8x128xf32>, vector<128x128xf32>, vector<8x128xf32> -> vector<8x128xf32>
    %208 = vector.extract_strided_slice %3 {offsets = [12, 0], sizes = [1, 128], strides = [1, 1]} : vector<13x128xf32> to vector<1x128xf32>
    %209 = vector.broadcast %208 : vector<1x128xf32> to vector<8x128xf32>
    %210 = arith.addf %207, %209 : vector<8x128xf32>
    %c4 = arith.constant 4 : index
    %c0_63 = arith.constant 0 : index
    %c0_64 = arith.constant 0 : index
    %211 = vector.load %arg1[%c4, %c0_63, %c0_64] : memref<5x128x128xf32, #tpu.memory_space<vmem>>, vector<1x128x128xf32>
    %212 = vector.shape_cast %211 : vector<1x128x128xf32> to vector<128x128xf32>
    %cst_65 = arith.constant dense<0.000000e+00> : vector<8x128xf32>
    %213 = tpu.matmul %134, %212, %cst_65 {dimension_numbers = #tpu.dot_dimension_numbers<[1], [0], [0], [1], [0, 0, 1, 1], [], []>} : vector<8x128xf32>, vector<128x128xf32>, vector<8x128xf32> -> vector<8x128xf32>
    %214 = arith.addf %210, %213 : vector<8x128xf32>
    %215 = arith.negf %214 : vector<8x128xf32>
    %216 = math.exp %215 : vector<8x128xf32>
    %cst_66 = arith.constant 1.000000e+00 : f32
    %217 = vector.broadcast %cst_66 : f32 to vector<8x128xf32>
    %218 = arith.addf %217, %216 : vector<8x128xf32>
    %219 = arith.divf %217, %218 : vector<8x128xf32>
    %220 = arith.subf %204, %134 : vector<8x128xf32>
    %221 = arith.mulf %219, %220 : vector<8x128xf32>
    %222 = arith.addf %134, %221 : vector<8x128xf32>
    %cst_67 = arith.constant dense<0.000000e+00> : vector<8xf32>
    %223 = vector.multi_reduction <add>, %222, %cst_67 [1] : vector<8x128xf32> to vector<8xf32>
    %224 = vector.shape_cast %223 : vector<8xf32> to vector<8x1xf32>
    %cst_68 = arith.constant 3.125000e-02 : f32
    %225 = vector.broadcast %cst_68 : f32 to vector<8x1xf32>
    %226 = arith.mulf %224, %225 : vector<8x1xf32>
    %227 = arith.mulf %222, %222 : vector<8x128xf32>
    %cst_69 = arith.constant dense<0.000000e+00> : vector<8xf32>
    %228 = vector.multi_reduction <add>, %227, %cst_69 [1] : vector<8x128xf32> to vector<8xf32>
    %229 = vector.shape_cast %228 : vector<8xf32> to vector<8x1xf32>
    %cst_70 = arith.constant 3.125000e-02 : f32
    %230 = vector.broadcast %cst_70 : f32 to vector<8x1xf32>
    %231 = arith.mulf %229, %230 : vector<8x1xf32>
    %232 = arith.mulf %226, %226 : vector<8x1xf32>
    %233 = arith.subf %231, %232 : vector<8x1xf32>
    %cst_71 = arith.constant 0.000000e+00 : f32
    %234 = vector.broadcast %cst_71 : f32 to vector<8x1xf32>
    %235 = arith.maximumf %233, %234 : vector<8x1xf32>
    %236 = vector.broadcast %226 : vector<8x1xf32> to vector<8x128xf32>
    %237 = arith.subf %222, %236 : vector<8x128xf32>
    %cst_72 = arith.constant 9.99999974E-6 : f32
    %238 = vector.broadcast %cst_72 : f32 to vector<8x1xf32>
    %239 = arith.addf %235, %238 : vector<8x1xf32>
    %240 = math.rsqrt %239 : vector<8x1xf32>
    %241 = vector.broadcast %240 : vector<8x1xf32> to vector<8x128xf32>
    %242 = arith.mulf %237, %241 : vector<8x128xf32>
    %243 = vector.extract_strided_slice %4 {offsets = [6, 0], sizes = [1, 128], strides = [1, 1]} : vector<8x128xf32> to vector<1x128xf32>
    %244 = vector.broadcast %243 : vector<1x128xf32> to vector<8x128xf32>
    %245 = arith.mulf %242, %244 : vector<8x128xf32>
    %246 = vector.extract_strided_slice %4 {offsets = [7, 0], sizes = [1, 128], strides = [1, 1]} : vector<8x128xf32> to vector<1x128xf32>
    %247 = vector.broadcast %246 : vector<1x128xf32> to vector<8x128xf32>
    %248 = arith.addf %245, %247 : vector<8x128xf32>
    %c0_73 = arith.constant 0 : index
    %249 = memref.load %arg7[%c0_73] : memref<3xf32, #tpu.memory_space<smem>>
    %250 = vector.broadcast %249 : f32 to vector<8x128xf32>
    %251 = arith.mulf %250, %248 : vector<8x128xf32>
    %c1_74 = arith.constant 1 : index
    %252 = memref.load %arg7[%c1_74] : memref<3xf32, #tpu.memory_space<smem>>
    %253 = vector.broadcast %252 : f32 to vector<8x128xf32>
    %254 = arith.mulf %253, %106 : vector<8x128xf32>
    %255 = arith.addf %251, %254 : vector<8x128xf32>
    %c2_75 = arith.constant 2 : index
    %256 = memref.load %arg7[%c2_75] : memref<3xf32, #tpu.memory_space<smem>>
    %257 = vector.broadcast %256 : f32 to vector<8x128xf32>
    %258 = arith.mulf %257, %162 : vector<8x128xf32>
    %259 = arith.addf %255, %258 : vector<8x128xf32>
    %260 = arith.addf %259, %0 : vector<8x128xf32>
    %c0_76 = arith.constant 0 : index
    %c0_77 = arith.constant 0 : index
    %261 = vector.load %arg11[%c0_76, %c0_77] : memref<8x128xf32, #tpu.memory_space<vmem>>, vector<8x128xf32>
    tpu.vector_store %arg11[%c0_76, %c0_77], %260 {strides = array<i32>} : memref<8x128xf32, #tpu.memory_space<vmem>>, vector<8x128xf32>,
    return
  }
  func.func @transform_0(%arg0: i32) -> (i32, i32, i32) {
    %c0_i32 = arith.constant 0 : i32
    %c0_i32_0 = arith.constant 0 : i32
    %c0_i32_1 = arith.constant 0 : i32
    %c0_i32_2 = arith.constant 0 : i32
    return %c0_i32, %c0_i32_0, %c0_i32_1 : i32, i32, i32
  }
  func.func @transform_1(%arg0: i32) -> (i32, i32) {
    %c0_i32 = arith.constant 0 : i32
    %c0_i32_0 = arith.constant 0 : i32
    %c0_i32_1 = arith.constant 0 : i32
    return %c0_i32, %c0_i32_0 : i32, i32
  }
  func.func @transform_2(%arg0: i32) -> (i32, i32) {
    %c0_i32 = arith.constant 0 : i32
    %c0_i32_0 = arith.constant 0 : i32
    %c0_i32_1 = arith.constant 0 : i32
    return %c0_i32, %c0_i32_0 : i32, i32
  }
  func.func @transform_3(%arg0: i32) -> (i32, i32) {
    %c0_i32 = arith.constant 0 : i32
    %c0_i32_0 = arith.constant 0 : i32
    %c0_i32_1 = arith.constant 0 : i32
    return %c0_i32, %c0_i32_0 : i32, i32
  }
  func.func @transform_4(%arg0: i32) -> (i32, i32) {
    %c0_i32 = arith.constant 0 : i32
    %c0_i32_0 = arith.constant 0 : i32
    %c0_i32_1 = arith.constant 0 : i32
    return %c0_i32, %c0_i32_0 : i32, i32
  }
  func.func @transform_5(%arg0: i32) -> (i32, i32) {
    %c0_i32 = arith.constant 0 : i32
    %c0_i32_0 = arith.constant 0 : i32
    %c0_i32_1 = arith.constant 0 : i32
    return %c0_i32, %c0_i32_0 : i32, i32
  }
  func.func @transform_6(%arg0: i32) -> i32 {
    %c0_i32 = arith.constant 0 : i32
    %c0_i32_0 = arith.constant 0 : i32
    return %c0_i32 : i32
  }
  func.func @transform_7(%arg0: i32) -> (i32, i32) {
    %c0_i32 = arith.constant 0 : i32
    %c0_i32_0 = arith.constant 0 : i32
    return %arg0, %c0_i32 : i32, i32
  }
  func.func @transform_8(%arg0: i32) -> (i32, i32) {
    %c0_i32 = arith.constant 0 : i32
    %c0_i32_0 = arith.constant 0 : i32
    return %arg0, %c0_i32 : i32, i32
  }
  func.func @transform_9(%arg0: i32) -> (i32, i32) {
    %c0_i32 = arith.constant 0 : i32
    %c0_i32_0 = arith.constant 0 : i32
    return %arg0, %c0_i32 : i32, i32
  }
  func.func @transform_10(%arg0: i32) -> (i32, i32) {
    %c0_i32 = arith.constant 0 : i32
    %c0_i32_0 = arith.constant 0 : i32
    return %arg0, %c0_i32 : i32, i32
  }
}

</mosaic_0001>

<bundles_post_ra>
// kernel: tpu_custom_call.1
= control target key start
LH: loop header
LB: loop body
LE: loop exit
PB: predicated region body
PF: predicated region fallthrough
CT: control target
= control target key end

     0   :  { %s2649_s0 = inlined_call_operand.hbm [shape: f32[5,128,128], index: 0, kind: input, shape index: {}]   ;;  %s2650_s1 = inlined_call_operand.hbm [shape: f32[128,384], index: 1, kind: input, shape index: {}]   ;;  %s2651_s2 = inlined_call_operand.hbm [shape: f32[128,384], index: 2, kind: input, shape index: {}]   ;;  %s2652_s3 = inlined_call_operand.hbm [shape: f32[128,512], index: 3, kind: input, shape index: {}]   ;;  %s2653_s4 = inlined_call_operand.hbm [shape: f32[13,128], index: 4, kind: input, shape index: {}]   ;;  %s2654_s5 = inlined_call_operand.hbm [shape: f32[8,128], index: 5, kind: input, shape index: {}]   ;;  %s2655_s6 = inlined_call_operand.vmem [shape: f32[3], index: 6, kind: input, shape index: {}]   ;;  %s2656_s7 = inlined_call_operand.hbm [shape: f32[16,128], index: 7, kind: input, shape index: {}]   ;;  %s2657_s8 = inlined_call_operand.hbm [shape: f32[16,128], index: 8, kind: input, shape index: {}]   ;;  %s2658_s9 = inlined_call_operand.hbm [shape: f32[16,128], index: 9, kind: input, shape index: {}]   ;;  %s2659_s10 = inlined_call_operand.hbm [shape: f32[16,128], index: 10, kind: output, shape index: {}]  }
   0x1   :  { %2675 = sst [smem:[#allocation34_spill]] %s2649_s0 }
   0x2   :  { %2676 = sst [smem:[#allocation35_spill]] %s2650_s1 }
   0x3   :  { %2677 = sst [smem:[#allocation36_spill]] %s2656_s7 }
   0x4   :  { %2678 = sst [smem:[#allocation37_spill]] %s2659_s10 }
   0x5   :  { %15 = vsyncpa [#allocation3], 0 }
   0x6   :  { %16 = vsyncpa [#allocation7], 0 }
   0x7   :  { %17 = vsyncpa [#allocation10], 0 }
   0x8   :  { %18 = vsyncpa [#allocation13], 0 }
   0x9   :  { %19 = vsyncpa [#allocation5], 0 }
   0xa   :  { %20 = vsyncpa [#allocation4], 0 }
   0xb   :  { %22 = vsyncpa [#allocation4 + $0x1], 0  ;;  %s2299_s13 = smov 0   ;;  %s2301_s14 = smov 0  }
   0xc   :  { %s2303_s15 = smov 0   ;;  %s2305_s16 = smov 0  }
   0xd LB: > { %2679 = sst [smem:[#allocation26_spill]] %s2217_s13  ;;  %s2323_s20 = sadd.s32 4294967295, %s2229_s16   ;;  %s2229_s16 = sphi %s2305_s16, %s2717_s16   ;;  %s2225_s15 = sphi %s2303_s15, %s2719_s15   ;;  %s2221_s14 = sphi %s2301_s14, %s2721_s14   ;;  %s2217_s13 = sphi %s2299_s13, %s2720_s13  }
   0xe   : > { %2680 = sst [smem:[#allocation27_spill]] %s2225_s15  ;;  %p1659_p0 = scmp.ge.s32.totalorder %s2229_s16, 1 }
   0xf   : > { %2681 = sst [smem:[#allocation28_spill]] %s2229_s16  ;;  %p2668_p1 = scmp.eq.s32.totalorder %s2323_s20, 0 }
  0x10   : > { %s2682_s0 = sld [smem:[#allocation34_spill]]  ;;  %p284_p2 = scmp.lt.s32.totalorder %s2229_s16, 3 }
  0x11   : > { %s2231_s22 = smov [#allocation2]   ;;  %s2660_s25 = smov 128  }
  0x12   : > { %p2328_p3 = pnand %p1659_p0, %p284_p2  ;;  %s297_s23 = sshll.u32 %s2231_s22, 4  ;;  %s298_s23 = int_to_ptr.vmem [resolvable:$true] %s297_s23 }
  0x13   : > { %s2661_s26 = smov 8   ;;  %s1658_s27 = sadd.s32 4294967294, %s2229_s16  }
  0x14   : > { %p1733_p4 = pneg %p2328_p3  ;;  %s2348_s28 = sadd.s32 1, %s2229_s16  }
  0x15   : > { %2685 = sst [smem:[#allocation29_spill]] %s2348_s28  ;;  %s182_s29 = sadd.s32 1, %s2225_s15 }
  0x16   : > { %s295_s19 = sshll.u32 %s2682_s0, 4  ;;  %p2337_p6 = pnand %p1733_p4, %p2668_p1  ;;  %s296_s19 = int_to_ptr.hbm [resolvable:$true] %s295_s19 }
  0x17   : > { %s179_s30 = ssub.s32 %s2229_s16, %s2348_s28  ;;  %p189_p7 = scmp.ne.s32.totalorder %s2225_s15, %s2221_s14 }
  0x18   : > { %1736 = dma.hbm_to_vmem [thread:$0]  (!%p2337_p6), %s296_s19, 10240, %s298_s23, [#allocation3], %s2660_s25, %s2660_s25, %s2661_s26  }
  0x19   : > { %p180_p8 = scmp.eq.s32.totalorder %s179_s30, 0  ;;  %p190_p9 = scmp.eq.s32.totalorder %s2229_s16, 0 }
  0x1a   : > { %p195_p10 = scmp.ne.s32.totalorder %s2221_s14, %s2217_s13  ;;  %p271_p11 = scmp.eq.s32.totalorder %s2323_s20, 1 }
  0x1b   : > { %s2360_s11 = scalar_select %p180_p8, %s2225_s15, %s182_s29  }
  0x1c   : > { %p2362_p12 = por %p190_p9, %p189_p7  ;;  %p2368_p13 = por %p2668_p1, %p195_p10 }
  0x1d   : > { %2686 = sst [smem:[#allocation30_spill]] %s2360_s11  ;;  %p2372_p0 = por %p271_p11, %p189_p7 }
  0x1e   : > { %s2688_s17 = scalar_select %p2368_p13, 1, 0 }
  0x1f   : > { %s2690_s18 = scalar_select %p2372_p0, 1, 0 }
  0x20   : > { %2689 = sst [smem:[#allocation31_spill]] %s2688_s17  ;;  %p277_p2 = scmp.eq.s32.totalorder %s1658_s27, 1 }
  0x21   : > { %2691 = sst [smem:[#allocation32_spill]] %s2690_s18  ;;  %p1776_p4 = scmp.lt.s32.totalorder %s2229_s16, 2 }
  0x22   : > { %s389_s19 = sand.u32 1, %s2229_s16   ;;  %p2378_p5 = por %p277_p2, %p195_p10 }
  0x23   : > { %s391_s23 = sand.u32 1, %s2225_s15   ;;  %s2384_s29 = sshll.u32 %s2229_s16, 3 }
  0x24   : > { %s2692_s22 = scalar_select %p2378_p5, 1, 0 }
  0x25   : > { %s2386_s30 = sshll.u32 %s391_s23, 3  ;;  %s2694_s7 = sld [smem:[#allocation36_spill]] }
  0x26   : > { %2693 = sst [smem:[#allocation33_spill]] %s2692_s22  ;;  %s393_s27 = scalar_lea.vmem [#allocation15], %s2386_s30 }
  0x27   : > { %s401_s28 = sshll.u32 %s393_s27, 4  ;;  %p2395_p7 = pnand %p1776_p4, %p2362_p12  ;;  %s402_s28 = int_to_ptr.vmem [resolvable:$true] %s401_s28 }
  0x28   : > { %s2696_s1 = sld [smem:[#allocation35_spill]]  ;;  %s2402_s25 = scalar_lea.sflag [#allocation3], %s389_s19 }
  0x29   : > { %p1892_p9 = pneg %p2395_p7 }
  0x2b   : > { %s397_s0 = scalar_lea.hbm %s2694_s7, %s2384_s29  ;;  %s1895_s15 = scalar_lea.hbm %s2694_s7, 16 }
  0x2c   : > { %s399_s11 = sshll.u32 %s397_s0, 4  ;;  %s400_s11 = int_to_ptr.hbm [resolvable:$true] %s399_s11 }
  0x2d   : > { %s1888_s26 = sshra.s32 %s400_s11, 4  ;;  %s1889_s26 = int_to_ptr.hbm [resolvable:$true] %s1888_s26 }
  0x2e   : > { %s309_s23 = sshll.u32 %s2696_s1, 4  ;;  %s1890_s0 = scalar_lea.hbm %s1889_s26, 8  ;;  %s310_s23 = int_to_ptr.hbm [resolvable:$true] %s309_s23 }
  0x2f   : > { %p1891_p8 = scmp.ne.s32.totalorder %s1889_s26, %s1890_s0  ;;  %p1896_p12 = scmp.lt.s32.totalorder %s1889_s26, %s2694_s7 }
  0x30   : > { %p1897_p2 = scmp.lt.s32.totalorder %s1895_s15, %s1890_s0 }
  0x31   : > { %p1893_p10 = pnand %p1892_p9, %p1891_p8 }
  0x32   : > { %p1898_p4 = por %p1897_p2, %p1896_p12 }
  0x33   : > { %p1894_p11 = pneg %p1893_p10 }
  0x35   : > { %p1899_p1 = pnand %p1898_p4, %p1894_p11 }
  0x37   : > { %1902 = shalt.err (!%p1899_p1)
}
  0x38   : > { %1758 = dma.hbm_to_vmem [thread:$0]  (!%p2395_p7), %s400_s11, 128, %s402_s28, %s2402_s25  }
  0x39   : > { %s2234_s19 = smov [#allocation6]   ;;  %s2674_s12 = smov 384  }
  0x3a   : > { %s311_s1 = sshll.u32 %s2234_s19, 4  ;;  %s2236_s27 = smov 24   ;;  %s312_s1 = int_to_ptr.vmem [resolvable:$true] %s311_s1 }
  0x3b   : > { %1739 = dma.hbm_to_vmem [thread:$0]  (!%p2337_p6), %s310_s23, 6144, %s312_s1, [#allocation7], %s2674_s12, %s2674_s12, %s2236_s27  }
  0x3c   : > { %s337_s0 = sshll.u32 %s2652_s3, 4  ;;  %s2237_s15 = smov [#allocation9]   ;;  %s338_s0 = int_to_ptr.hbm [resolvable:$true] %s337_s0 }
  0x3d   : > { %s339_s16 = sshll.u32 %s2237_s15, 4  ;;  %s2238_s28 = smov 512   ;;  %s340_s16 = int_to_ptr.vmem [resolvable:$true] %s339_s16 }
  0x3e   : > { %s2239_s11 = smov 32   ;;  %s416_s18 = scalar_lea.hbm %s2657_s8, %s2384_s29 }
  0x3f   : > { %1745 = dma.hbm_to_vmem [thread:$0]  (!%p2337_p6), %s338_s0, 8192, %s340_s16, [#allocation10], %s2238_s28, %s2238_s28, %s2239_s11  }
  0x40   : > { %s412_s10 = scalar_lea.vmem [#allocation16], %s2386_s30  ;;  %s418_s1 = sshll.u32 %s416_s18, 4  ;;  %s419_s1 = int_to_ptr.hbm [resolvable:$true] %s418_s1 }
  0x41   : > { %s420_s17 = sshll.u32 %s412_s10, 4  ;;  %s323_s26 = sshll.u32 %s2651_s2, 4  ;;  %s421_s17 = int_to_ptr.vmem [resolvable:$true] %s420_s17  ;;  %s324_s26 = int_to_ptr.hbm [resolvable:$true] %s323_s26 }
  0x42   : > { %s1978_s15 = sshra.s32 %s419_s1, 4  ;;  %s1985_s16 = scalar_lea.hbm %s2657_s8, 16  ;;  %s1979_s15 = int_to_ptr.hbm [resolvable:$true] %s1978_s15 }
  0x43   : > { %s1980_s12 = scalar_lea.hbm %s1979_s15, 8  ;;  %p1986_p11 = scmp.lt.s32.totalorder %s1979_s15, %s2657_s8 }
  0x44   : > { %p1981_p1 = scmp.ne.s32.totalorder %s1979_s15, %s1980_s12  ;;  %p1987_p12 = scmp.lt.s32.totalorder %s1985_s16, %s1980_s12 }
  0x46   : > { %p1983_p8 = pnand %p1981_p1, %p1892_p9  ;;  %p1988_p2 = por %p1987_p12, %p1986_p11 }
  0x48   : > { %p1984_p10 = pneg %p1983_p8 }
  0x4a   : > { %p1989_p4 = pnand %p1988_p2, %p1984_p10 }
  0x4c   : > { %1992 = shalt.err (!%p1989_p4)
}
  0x4d   : > { %1761 = dma.hbm_to_vmem [thread:$0]  (!%p2395_p7), %s419_s1, 128, %s421_s17, %s2402_s25  }
  0x4e   : > { %s2240_s28 = smov [#allocation8]   ;;  %s351_s22 = sshll.u32 %s2653_s4, 4  ;;  %s352_s22 = int_to_ptr.hbm [resolvable:$true] %s351_s22 }
  0x4f   : > { %s325_s11 = sshll.u32 %s2240_s28, 4  ;;  %s2697_s12 = smov 384   ;;  %s326_s11 = int_to_ptr.vmem [resolvable:$true] %s325_s11 }
  0x50   : > { %1742 = dma.hbm_to_vmem [thread:$0]  (!%p2337_p6), %s324_s26, 6144, %s326_s11, [#allocation7], %s2697_s12, %s2697_s12, %s2236_s27  }
  0x51   : > { %s366_s17 = sshll.u32 %s2654_s5, 4  ;;  %s2241_s1 = smov [#allocation11]   ;;  %s367_s17 = int_to_ptr.hbm [resolvable:$true] %s366_s17 }
  0x52   : > { %s353_s7 = sshll.u32 %s2241_s1, 4  ;;  %s2698_s16 = smov 8   ;;  %s354_s7 = int_to_ptr.vmem [resolvable:$true] %s353_s7 }
  0x53   : > { %s2699_s10 = smov 128   ;;  %s2242_s18 = smov [#allocation12]  }
  0x54   : > { %1748 = dma.hbm_to_vmem [thread:$0]  (!%p2337_p6), %s352_s22, 256, %s354_s7, [#allocation10], %s2699_s10, %s2699_s10, %s2698_s16  }
  0x55   : > { %s368_s28 = sshll.u32 %s2242_s18, 4  ;;  %s378_s27 = sshll.u32 %s2655_s6, 4  ;;  %s369_s28 = int_to_ptr.vmem [resolvable:$true] %s368_s28  ;;  %s379_s27 = int_to_ptr.vmem [resolvable:$true] %s378_s27 }
  0x56   : > { %1751 = dma.hbm_to_vmem [thread:$0]  (!%p2337_p6), %s367_s17, 128, %s369_s28, [#allocation13]  }
  0x57   : > { %s2243_s26 = smov [#allocation14]   ;;  %s435_s15 = scalar_lea.hbm %s2658_s9, %s2384_s29 }
  0x58   : > { %1754 = dma.vmem_to_smem (!%p2337_p6), %s379_s27, 16, %s2243_s26, [#allocation5]  }
  0x59   : > { %s431_s0 = scalar_lea.vmem [#allocation17], %s2386_s30  ;;  %s437_s1 = sshll.u32 %s435_s15, 4  ;;  %s438_s1 = int_to_ptr.hbm [resolvable:$true] %s437_s1 }
  0x5a   : > { %s439_s22 = sshll.u32 %s431_s0, 4  ;;  %s2113_s7 = sshra.s32 %s438_s1, 4  ;;  %s440_s22 = int_to_ptr.vmem [resolvable:$true] %s439_s22  ;;  %s2114_s7 = int_to_ptr.hbm [resolvable:$true] %s2113_s7 }
  0x5b   : > { %s2115_s16 = scalar_lea.hbm %s2114_s7, 8  ;;  %s2120_s10 = scalar_lea.hbm %s2658_s9, 16 }
  0x5c   : > { %p2116_p1 = scmp.ne.s32.totalorder %s2114_s7, %s2115_s16  ;;  %p2121_p6 = scmp.lt.s32.totalorder %s2114_s7, %s2658_s9 }
  0x5d   : > { %p2122_p11 = scmp.lt.s32.totalorder %s2120_s10, %s2115_s16 }
  0x5e   : > { %p2118_p8 = pnand %p2116_p1, %p1892_p9 }
  0x5f   : > { %p2123_p12 = por %p2122_p11, %p2121_p6 }
  0x60   : > { %p2119_p10 = pneg %p2118_p8 }
  0x62   : > { %p2124_p2 = pnand %p2123_p12, %p2119_p10 }
  0x64   : > { %2127 = shalt.err (!%p2124_p2)
}
  0x65   : > { %1764 = dma.hbm_to_vmem [thread:$0]  (!%p2395_p7), %s438_s1, 128, %s440_s22, %s2402_s25  }
  0x66   : > { %448 = sbr.rel (%p2328_p3) target bundleno = 1727 (0x6bf), region = 60  ;;  %p2700_p9 = scmp.eq.s32.totalorder (!%p2328_p3), %s2323_s20, 0 }
  0x6b   : > { %2188 = dma.done.wait (%p2700_p9), [#allocation3], 10240   ;;  %p2701_p4 = pmov %p2700_p9 }
  0x6d   : > { %2190 = vsyncadd (%p2701_p4), [#allocation3], 4294957056  ;;  %p2702_p1 = pmov %p2701_p4 }
  0x6f   : > { %2192 = dma.done.wait (%p2702_p1), [#allocation7], 12288   ;;  %p2703_p8 = pmov %p2702_p1 }
  0x70   : > { %p2704_p10 = pmov %p2702_p1 }
  0x71   : > { %2194 = vsyncadd (%p2703_p8), [#allocation7], 4294955008 }
  0x72   : > { %2196 = dma.done.wait (%p2704_p10), [#allocation10], 8448   ;;  %p2705_p7 = pmov %p2702_p1 }
  0x73   : > { %p2706_p3 = pmov %p2702_p1 }
  0x74   : > { %2198 = vsyncadd (%p2705_p7), [#allocation10], 4294958848 }
  0x75   : > { %2200 = dma.done.wait (%p2706_p3), [#allocation13], 128   ;;  %p2707_p6 = pmov %p2702_p1 }
  0x76   : > { %p2708_p11 = pmov %p2702_p1 }
  0x77   : > { %2202 = vsyncadd (%p2707_p6), [#allocation13], 4294967168 }
  0x78   : > { %2204 = dma.done.wait (%p2708_p11), [#allocation5], 16   ;;  %p2709_p12 = pmov %p2702_p1 }
  0x79   : > { %s485_s21 = sand.u32 1, %s2323_s20   ;;  %s487_s29 = sand.u32 1, %s2221_s14  }
  0x7a   : > { %2206 = vsyncadd (%p2709_p12), [#allocation5], 4294967280  ;;  %s2514_s30 = sshll.u32 %s487_s29, 3  ;;  %s486_s25 = scalar_lea.sflag [#allocation3], %s485_s21 }
  0x7b   : > { %s489_s19 = scalar_lea.vmem [#allocation15], %s2514_s30 }
  0x7c   : > { %2208 = dma.done.wait (%p2368_p13), %s486_s25, 384  }
  0x7d   : > { %2210 = vsyncadd (%p2368_p13), %s486_s25, 4294966912  ;;  %s499_s23 = scalar_lea.vmem [#allocation16], %s2514_s30  ;;  %s509_s27 = scalar_lea.vmem [#allocation17], %s2514_s30 }
  0x7e   : > { %515 = sfence }
  0x7f   : > { %v579_v0 = vld [vmem:[#allocation2 + $0x78] sm:$0xff]  ;;  %v578_v2 = vld [vmem:[#allocation2 + $0x70] sm:$0xff]  ;;  %v577_v4 = vld [vmem:[#allocation2 + $0x68] sm:$0xff]  ;;  %vm1081_vm6 = vcmask 64512   ;;  %s1691_s26 = sld [smem:[#allocation14 + $0x1]]  ;;  %s1694_s15 = sshll.u32 %s2323_s20, 3 }
  0x80   : > { %v645_v1 = vld [vmem:[#allocation2 + $0xf8] sm:$0xff]  ;;  %581 = vmatpush.msra.mxu0 %v579_v0  ;;  %v644_v3 = vld [vmem:[#allocation2 + $0xf0] sm:$0xff]  ;;  %v643_v5 = vld [vmem:[#allocation2 + $0xe8] sm:$0xff]  ;;  %s1450_s11 = sld [smem:[#allocation14]]  ;;  %s557_s17 = scalar_lea.vmem [#allocation18], %s2514_s30 }
  0x81   : > { %647 = vmatpush.msra.mxu1 %v645_v1  ;;  %v576_v6 = vld [vmem:[#allocation2 + $0x60] sm:$0xff]  ;;  %v575_v8 = vld [vmem:[#allocation2 + $0x58] sm:$0xff]  ;;  %v574_v10 = vld [vmem:[#allocation2 + $0x50] sm:$0xff]  ;;  %s1692_s12 = sld [smem:[#allocation14 + $0x2]]  ;;  %s1476_s24 = sshll.u32 %s557_s17, 4  ;;  %s1477_s24 = int_to_ptr.vmem [resolvable:$true] %s1476_s24 }
  0x82   : > { %582 = vmatpush.msra.mxu0 %v578_v2  ;;  %v642_v7 = vld [vmem:[#allocation2 + $0xe0] sm:$0xff]  ;;  %v641_v9 = vld [vmem:[#allocation2 + $0xd8] sm:$0xff]  ;;  %v640_v11 = vld [vmem:[#allocation2 + $0xd0] sm:$0xff]  ;;  %s2711_s1 = sld [smem:[#allocation37_spill]]  ;;  %s1464_s20 = scalar_lea.sflag [#allocation4], %s487_s29 }
  0x83   : > { %648 = vmatpush.msra.mxu1 %v644_v3  ;;  %v573_v12 = vld [vmem:[#allocation2 + $0x48] sm:$0xff]  ;;  %v572_v14 = vld [vmem:[#allocation2 + $0x40] sm:$0xff]  ;;  %v571_v16 = vld [vmem:[#allocation2 + $0x38] sm:$0xff] }
  0x84   : > { %583 = vmatpush.msra.mxu0 %v577_v4  ;;  %v639_v13 = vld [vmem:[#allocation2 + $0xc8] sm:$0xff]  ;;  %v638_v15 = vld [vmem:[#allocation2 + $0xc0] sm:$0xff]  ;;  %v637_v17 = vld [vmem:[#allocation2 + $0xb8] sm:$0xff] }
  0x85   : > { %649 = vmatpush.msra.mxu1 %v643_v5  ;;  %v570_v18 = vld [vmem:[#allocation2 + $0x30] sm:$0xff]  ;;  %v569_v20 = vld [vmem:[#allocation2 + $0x28] sm:$0xff]  ;;  %v568_v22 = vld [vmem:[#allocation2 + $0x20] sm:$0xff] }
  0x86   : > { %584 = vmatpush.msra.mxu0 %v576_v6  ;;  %v636_v19 = vld [vmem:[#allocation2 + $0xb0] sm:$0xff]  ;;  %v635_v21 = vld [vmem:[#allocation2 + $0xa8] sm:$0xff]  ;;  %v634_v23 = vld [vmem:[#allocation2 + $0xa0] sm:$0xff] }
  0x87   : > { %650 = vmatpush.msra.mxu1 %v642_v7  ;;  %v567_v24 = vld [vmem:[#allocation2 + $0x18] sm:$0xff]  ;;  %v566_v26 = vld [vmem:[#allocation2 + $0x10] sm:$0xff]  ;;  %v565_v28 = vld [vmem:[#allocation2 + $0x8] sm:$0xff] }
  0x88   : > { %585 = vmatpush.msra.mxu0 %v575_v8  ;;  %v633_v25 = vld [vmem:[#allocation2 + $0x98] sm:$0xff]  ;;  %v632_v27 = vld [vmem:[#allocation2 + $0x90] sm:$0xff]  ;;  %v631_v29 = vld [vmem:[#allocation2 + $0x88] sm:$0xff]  ;;  %s1474_s7 = scalar_lea.hbm %s2711_s1, %s1694_s15  ;;  %s2163_s30 = scalar_lea.hbm %s2711_s1, 16 }
  0x89   : > { %651 = vmatpush.msra.mxu1 %v641_v9  ;;  %v564_v30 = vld [vmem:[#allocation2] sm:$0xff]  ;;  %v559_v33 = vld [vmem:[%s499_s23] sm:$0xff]  ;;  %v738_v37 = vld [vmem:[#allocation6 + $0x158] sm:$0xff]  ;;  %s1478_s10 = sshll.u32 %s1474_s7, 4  ;;  %s1479_s10 = int_to_ptr.hbm [resolvable:$true] %s1478_s10 }
  0x8a   : > { %586 = vmatpush.msra.mxu0 %v574_v10  ;;  %v630_v31 = vld [vmem:[#allocation2 + $0x80] sm:$0xff]  ;;  %v740_v34 = vld [vmem:[#allocation6 + $0x168] sm:$0xff]  ;;  %v741_v35 = vld [vmem:[#allocation6 + $0x170] sm:$0xff]  ;;  %s2157_s18 = sshra.s32 %s1479_s10, 4  ;;  %s2158_s18 = int_to_ptr.hbm [resolvable:$true] %s2157_s18 }
  0x8b   : > { %652 = vmatpush.msra.mxu1 %v640_v11  ;;  %v560_v32 = vld [vmem:[%s509_s27] sm:$0xff]  ;;  %v737_v36 = vld [vmem:[#allocation6 + $0x150] sm:$0xff]  ;;  %743 = vmatpush.msra.mxu2 %v740_v34  ;;  %v732_v41 = vld [vmem:[#allocation6 + $0x128] sm:$0xff]  ;;  %s2159_s28 = scalar_lea.hbm %s2158_s18, 8  ;;  %p2164_p4 = scmp.lt.s32.totalorder %s2158_s18, %s2711_s1 }
  0x8c   : > { %587 = vmatpush.msra.mxu0 %v573_v12  ;;  %763 = vmatpush.msra.mxu3 %v741_v35  ;;  %v734_v38 = vld [vmem:[#allocation6 + $0x138] sm:$0xff]  ;;  %v735_v39 = vld [vmem:[#allocation6 + $0x140] sm:$0xff]  ;;  %v728_v42 = vld [vmem:[#allocation6 + $0x108] sm:$0xff]  ;;  %p2160_p13 = scmp.ne.s32.totalorder %s2158_s18, %s2159_s28  ;;  %p2165_p1 = scmp.lt.s32.totalorder %s2163_s30, %s2159_s28 }
  0x8d   : > { %653 = vmatpush.msra.mxu1 %v639_v13  ;;  %744 = vmatpush.msra.mxu2 %v737_v36  ;;  %v731_v40 = vld [vmem:[#allocation6 + $0x120] sm:$0xff]  ;;  %v729_v43 = vld [vmem:[#allocation6 + $0x110] sm:$0xff]  ;;  %v726_v45 = vld [vmem:[#allocation6 + $0xf8] sm:$0xff] }
  0x8e   : > { %588 = vmatpush.msra.mxu0 %v572_v14  ;;  %764 = vmatpush.msra.mxu3 %v738_v37  ;;  %v725_v44 = vld [vmem:[#allocation6 + $0xf0] sm:$0xff]  ;;  %v742_v46 = vld [vmem:[#allocation6 + $0x178] sm:$0xff]  ;;  %v739_v47 = vld [vmem:[#allocation6 + $0x160] sm:$0xff]  ;;  %p2161_p2 = pnand %p2160_p13, %p2372_p0  ;;  %p2166_p8 = por %p2165_p1, %p2164_p4 }
  0x8f   : > { %654 = vmatpush.msra.mxu1 %v638_v15  ;;  %745 = vmatpush.msra.mxu2 %v734_v38  ;;  %v722_v48 = vld [vmem:[#allocation6 + $0xd8] sm:$0xff]  ;;  %v723_v49 = vld [vmem:[#allocation6 + $0xe0] sm:$0xff]  ;;  %v736_v50 = vld [vmem:[#allocation6 + $0x148] sm:$0xff] }
  0x90   : > { %589 = vmatpush.msra.mxu0 %v571_v16  ;;  %765 = vmatpush.msra.mxu3 %v735_v39  ;;  %v719_v51 = vld [vmem:[#allocation6 + $0xc0] sm:$0xff]  ;;  %v720_v52 = vld [vmem:[#allocation6 + $0xc8] sm:$0xff]  ;;  %v733_v54 = vld [vmem:[#allocation6 + $0x130] sm:$0xff]  ;;  %p2162_p9 = pneg %p2161_p2 }
  0x91   : > { %655 = vmatpush.msra.mxu1 %v637_v17  ;;  %746 = vmatpush.msra.mxu2 %v731_v40  ;;  %v848_v53 = vld [vmem:[#allocation8 + $0x168] sm:$0xff]  ;;  %v845_v55 = vld [vmem:[#allocation8 + $0x150] sm:$0xff]  ;;  %v2527_v58 = vld [vmem:[#allocation11] sm:$0xff] }
  0x92   : > { %590 = vmatpush.msra.mxu0 %v570_v18  ;;  %766 = vmatpush.msra.mxu3 %v732_v41  ;;  %v716_v56 = vld [vmem:[#allocation6 + $0xa8] sm:$0xff]  ;;  %v717_v57 = vld [vmem:[#allocation6 + $0xb0] sm:$0xff]  ;;  %v730_v59 = vld [vmem:[#allocation6 + $0x118] sm:$0xff]  ;;  %v580_v1 = vperm.slane %v2527_v58, 0  ;;  %v646_v2 = vperm.slane %v2527_v58, 1  ;;  %p2167_p10 = pnand %p2166_p8, %p2162_p9 }
  0x93   : > { %656 = vmatpush.msra.mxu1 %v636_v19  ;;  %747 = vmatpush.msra.mxu2 %v728_v42  ;;  %v842_v60 = vld [vmem:[#allocation8 + $0x138] sm:$0xff]  ;;  %v713_v61 = vld [vmem:[#allocation6 + $0x90] sm:$0xff]  ;;  %v727_v63 = vld [vmem:[#allocation6 + $0x100] sm:$0xff] }
  0x94   : > { %591 = vmatpush.msra.mxu0 %v569_v20  ;;  %767 = vmatpush.msra.mxu3 %v729_v43  ;;  %v714_v62 = vld [vmem:[#allocation6 + $0x98] sm:$0xff]  ;;  %v839_v0 = vld [vmem:[#allocation8 + $0x120] sm:$0xff]  ;;  %v724_v5 = vld [vmem:[#allocation6 + $0xe8] sm:$0xff] }
  0x95   : > { %657 = vmatpush.msra.mxu1 %v635_v21  ;;  %748 = vmatpush.msra.mxu2 %v725_v44  ;;  %v710_v3 = vld [vmem:[#allocation6 + $0x78] sm:$0xff]  ;;  %v711_v4 = vld [vmem:[#allocation6 + $0x80] sm:$0xff]  ;;  %v836_v6 = vld [vmem:[#allocation8 + $0x108] sm:$0xff] }
  0x96   : > { %592 = vmatpush.msra.mxu0 %v568_v22  ;;  %768 = vmatpush.msra.mxu3 %v726_v45  ;;  %v707_v7 = vld [vmem:[#allocation6 + $0x60] sm:$0xff]  ;;  %v708_v8 = vld [vmem:[#allocation6 + $0x68] sm:$0xff]  ;;  %v705_v14 = vld [vmem:[#allocation6 + $0x50] sm:$0xff] }
  0x97   : > { %658 = vmatpush.msra.mxu1 %v634_v23  ;;  %749 = vmatpush.msra.mxu2 %v722_v48  ;;  %v704_v13 = vld [vmem:[#allocation6 + $0x48] sm:$0xff]  ;;  %v721_v15 = vld [vmem:[#allocation6 + $0xd0] sm:$0xff]  ;;  %v702_v18 = vld [vmem:[#allocation6 + $0x38] sm:$0xff] }
  0x98   : > { %593 = vmatpush.msra.mxu0 %v567_v24  ;;  %769 = vmatpush.msra.mxu3 %v723_v49  ;;  %v833_v16 = vld [vmem:[#allocation8 + $0xf0] sm:$0xff]  ;;  %v718_v19 = vld [vmem:[#allocation6 + $0xb8] sm:$0xff]  ;;  %v699_v21 = vld [vmem:[#allocation6 + $0x20] sm:$0xff] }
  0x99   : > { %659 = vmatpush.msra.mxu1 %v633_v25  ;;  %750 = vmatpush.msra.mxu2 %v719_v51  ;;  %v701_v17 = vld [vmem:[#allocation6 + $0x30] sm:$0xff]  ;;  %v698_v20 = vld [vmem:[#allocation6 + $0x18] sm:$0xff]  ;;  %v715_v22 = vld [vmem:[#allocation6 + $0xa0] sm:$0xff] }
  0x9a   : > { %594 = vmatpush.msra.mxu0 %v566_v26  ;;  %770 = vmatpush.msra.mxu3 %v720_v52  ;;  %v695_v24 = vld [vmem:[#allocation6] sm:$0xff]  ;;  %v696_v25 = vld [vmem:[#allocation6 + $0x8] sm:$0xff]  ;;  %v841_v34 = vld [vmem:[#allocation8 + $0x130] sm:$0xff] }
  0x9b   : > { %660 = vmatpush.msra.mxu1 %v632_v27  ;;  %751 = vmatpush.msra.mxu2 %v716_v56  ;;  %v849_v27 = vld [vmem:[#allocation8 + $0x170] sm:$0xff]  ;;  %v838_v36 = vld [vmem:[#allocation8 + $0x118] sm:$0xff]  ;;  %v835_v38 = vld [vmem:[#allocation8 + $0x100] sm:$0xff] }
  0x9c   : > { %595 = vmatpush.msra.mxu0 %v565_v28  ;;  %771 = vmatpush.msra.mxu3 %v717_v57  ;;  %v850_v28 = vld [vmem:[#allocation8 + $0x178] sm:$0xff]  ;;  %v837_v35 = vld [vmem:[#allocation8 + $0x110] sm:$0xff]  ;;  %v712_v39 = vld [vmem:[#allocation6 + $0x88] sm:$0xff] }
  0x9d   : > { %661 = vmatpush.msra.mxu1 %v631_v29  ;;  %752 = vmatpush.msra.mxu2 %v713_v61  ;;  %v846_v29 = vld [vmem:[#allocation8 + $0x158] sm:$0xff]  ;;  %v831_v41 = vld [vmem:[#allocation8 + $0xe0] sm:$0xff]  ;;  %v832_v42 = vld [vmem:[#allocation8 + $0xe8] sm:$0xff] }
  0x9e   : > { %596 = vmatpush.msra.mxu0 %v564_v30  ;;  %772 = vmatpush.msra.mxu3 %v714_v62  ;;  %v847_v30 = vld [vmem:[#allocation8 + $0x160] sm:$0xff]  ;;  %v834_v37 = vld [vmem:[#allocation8 + $0xf8] sm:$0xff]  ;;  %v709_v43 = vld [vmem:[#allocation6 + $0x70] sm:$0xff] }
  0x9f   : > { %662 = vmatpush.msra.mxu1 %v630_v31  ;;  %597 = vmatmul.f32.vlgmr.msra.gmra.mxu0 %v560_v32  ;;  %v843_v31 = vld [vmem:[#allocation8 + $0x140] sm:$0xff]  ;;  %v844_v32 = vld [vmem:[#allocation8 + $0x148] sm:$0xff]  ;;  %v830_v40 = vld [vmem:[#allocation8 + $0xd8] sm:$0xff] }
  0xa0   : > { %663 = vmatmul.f32.vlgmr.msra.gmra.mxu1 %v559_v33  ;;  %783 = vmatpush.msrb.mxu0 %v742_v46  ;;  %v840_v33 = vld [vmem:[#allocation8 + $0x128] sm:$0xff]  ;;  %v827_v44 = vld [vmem:[#allocation8 + $0xc0] sm:$0xff]  ;;  %v829_v46 = vld [vmem:[#allocation8 + $0xd0] sm:$0xff] }
  0xa1   : > { %851 = vmatpush.msrb.mxu1 %v848_v53  ;;  %753 = vmatpush.msra.mxu2 %v710_v3  ;;  %v828_v45 = vld [vmem:[#allocation8 + $0xc8] sm:$0xff]  ;;  %v825_v49 = vld [vmem:[#allocation8 + $0xb0] sm:$0xff]  ;;  %v703_v51 = vld [vmem:[#allocation6 + $0x40] sm:$0xff] }
  0xa2   : > { %784 = vmatpush.msrb.mxu0 %v739_v47  ;;  %773 = vmatpush.msra.mxu3 %v711_v4  ;;  %v706_v47 = vld [vmem:[#allocation6 + $0x58] sm:$0xff]  ;;  %v824_v48 = vld [vmem:[#allocation8 + $0xa8] sm:$0xff]  ;;  %v821_v52 = vld [vmem:[#allocation8 + $0x90] sm:$0xff] }
  0xa3   : > { %852 = vmatpush.msrb.mxu1 %v845_v55  ;;  %754 = vmatpush.msra.mxu2 %v707_v7  ;;  %v822_v53 = vld [vmem:[#allocation8 + $0x98] sm:$0xff]  ;;  %v700_v55 = vld [vmem:[#allocation6 + $0x28] sm:$0xff]  ;;  %v819_v57 = vld [vmem:[#allocation8 + $0x80] sm:$0xff] }
  0xa4   : > { %785 = vmatpush.msrb.mxu0 %v736_v50  ;;  %774 = vmatpush.msra.mxu3 %v708_v8  ;;  %v826_v50 = vld [vmem:[#allocation8 + $0xb8] sm:$0xff]  ;;  %v815_v61 = vld [vmem:[#allocation8 + $0x60] sm:$0xff]  ;;  %v816_v62 = vld [vmem:[#allocation8 + $0x68] sm:$0xff] }
  0xa5   : > { %853 = vmatpush.msrb.mxu1 %v842_v60  ;;  %755 = vmatpush.msra.mxu2 %v704_v13  ;;  %v818_v56 = vld [vmem:[#allocation8 + $0x78] sm:$0xff]  ;;  %v697_v60 = vld [vmem:[#allocation6 + $0x10] sm:$0xff]  ;;  %v967_v4 = vld [vmem:[#allocation9 + $0x1c0] sm:$0xff] }
  0xa6   : > { %786 = vmatpush.msrb.mxu0 %v733_v54  ;;  %775 = vmatpush.msra.mxu3 %v705_v14  ;;  %v823_v54 = vld [vmem:[#allocation8 + $0xa0] sm:$0xff]  ;;  %v814_v3 = vld [vmem:[#allocation8 + $0x58] sm:$0xff]  ;;  %v808_v13 = vld [vmem:[#allocation8 + $0x28] sm:$0xff] }
  0xa7   : > { %854 = vmatpush.msrb.mxu1 %v839_v0  ;;  %756 = vmatpush.msra.mxu2 %v701_v17  ;;  %v971_v0 = vld [vmem:[#allocation9 + $0x1e0] sm:$0xff]  ;;  %v805_v17 = vld [vmem:[#allocation8 + $0x10] sm:$0xff] }
  0xa8   : > { %787 = vmatpush.msrb.mxu0 %v730_v59  ;;  %776 = vmatpush.msra.mxu3 %v702_v18  ;;  %v820_v59 = vld [vmem:[#allocation8 + $0x88] sm:$0xff]  ;;  %v811_v7 = vld [vmem:[#allocation8 + $0x40] sm:$0xff] }
  0xa9   : > { %855 = vmatpush.msrb.mxu1 %v836_v6  ;;  %757 = vmatpush.msra.mxu2 %v698_v20  ;;  %v810_v6 = vld [vmem:[#allocation8 + $0x38] sm:$0xff]  ;;  %v963_v8 = vld [vmem:[#allocation9 + $0x1a0] sm:$0xff]  ;;  %v972_v20 = vld [vmem:[#allocation9 + $0x1e8] sm:$0xff] }
  0xaa   : > { %788 = vmatpush.msrb.mxu0 %v727_v63  ;;  %777 = vmatpush.msra.mxu3 %v699_v21  ;;  %v817_v63 = vld [vmem:[#allocation8 + $0x70] sm:$0xff]  ;;  %v959_v14 = vld [vmem:[#allocation9 + $0x180] sm:$0xff] }
  0xab   : > { %856 = vmatpush.msrb.mxu1 %v833_v16  ;;  %758 = vmatpush.msra.mxu2 %v695_v24  ;;  %v804_v16 = vld [vmem:[#allocation8 + $0x8] sm:$0xff]  ;;  %v2543_v18 = vld [vmem:[%s489_s19] sm:$0xff]  ;;  %v973_v21 = vld [vmem:[#allocation9 + $0x1f0] sm:$0xff] }
  0xac   : > { %789 = vmatpush.msrb.mxu0 %v724_v5  ;;  %778 = vmatpush.msra.mxu3 %v696_v25  ;;  %v809_v5 = vld [vmem:[#allocation8 + $0x30] sm:$0xff]  ;;  %v968_v24 = vld [vmem:[#allocation9 + $0x1c8] sm:$0xff] }
  0xad   : > { %871 = vmatpush.msrb.mxu2 %v849_v27  ;;  %857 = vmatpush.msrb.mxu1 %v830_v40  ;;  %v969_v25 = vld [vmem:[#allocation9 + $0x1d0] sm:$0xff]  ;;  %v947_v27 = vld [vmem:[#allocation9 + $0x120] sm:$0xff]  ;;  %v952_v40 = vld [vmem:[#allocation9 + $0x148] sm:$0xff] }
  0xae   : > { %790 = vmatpush.msrb.mxu0 %v721_v15  ;;  %891 = vmatpush.msrb.mxu3 %v850_v28  ;;  %v803_v15 = vld [vmem:[#allocation8] sm:$0xff]  ;;  %v964_v28 = vld [vmem:[#allocation9 + $0x1a8] sm:$0xff] }
  0xaf   : > { %872 = vmatpush.msrb.mxu2 %v846_v29  ;;  %858 = vmatpush.msrb.mxu1 %v827_v44  ;;  %v965_v29 = vld [vmem:[#allocation9 + $0x1b0] sm:$0xff] }
  0xb0   : > { %791 = vmatpush.msrb.mxu0 %v718_v19  ;;  %892 = vmatpush.msrb.mxu3 %v847_v30  ;;  %v955_v19 = vld [vmem:[#allocation9 + $0x160] sm:$0xff]  ;;  %v966_v30 = vld [vmem:[#allocation9 + $0x1b8] sm:$0xff] }
  0xb1   : > { %873 = vmatpush.msrb.mxu2 %v843_v31  ;;  %859 = vmatpush.msrb.mxu1 %v824_v48  ;;  %v943_v31 = vld [vmem:[#allocation9 + $0x100] sm:$0xff]  ;;  %v950_v48 = vld [vmem:[#allocation9 + $0x138] sm:$0xff] }
  0xb2   : > { %792 = vmatpush.msrb.mxu0 %v715_v22  ;;  %893 = vmatpush.msrb.mxu3 %v844_v32  ;;  %v974_v22 = vld [vmem:[#allocation9 + $0x1f8] sm:$0xff]  ;;  %v960_v32 = vld [vmem:[#allocation9 + $0x188] sm:$0xff] }
  0xb3   : > { %874 = vmatpush.msrb.mxu2 %v840_v33  ;;  %860 = vmatpush.msrb.mxu1 %v821_v52  ;;  %v961_v33 = vld [vmem:[#allocation9 + $0x190] sm:$0xff] }
  0xb4   : > { %894 = vmatpush.msrb.mxu3 %v841_v34  ;;  %793 = vmatpush.msrb.mxu0 %v712_v39  ;;  %v962_v34 = vld [vmem:[#allocation9 + $0x198] sm:$0xff]  ;;  %v935_v39 = vld [vmem:[#allocation9 + $0xc0] sm:$0xff]  ;;  %v945_v52 = vld [vmem:[#allocation9 + $0x110] sm:$0xff] }
  0xb5   : > { %875 = vmatpush.msrb.mxu2 %v837_v35  ;;  %861 = vmatpush.msrb.mxu1 %v818_v56  ;;  %v939_v35 = vld [vmem:[#allocation9 + $0xe0] sm:$0xff]  ;;  %v940_v56 = vld [vmem:[#allocation9 + $0xe8] sm:$0xff] }
  0xb6   : > { %895 = vmatpush.msrb.mxu3 %v838_v36  ;;  %794 = vmatpush.msrb.mxu0 %v709_v43  ;;  %v956_v36 = vld [vmem:[#allocation9 + $0x168] sm:$0xff] }
  0xb7   : > { %876 = vmatpush.msrb.mxu2 %v834_v37  ;;  %862 = vmatpush.msrb.mxu1 %v815_v61  ;;  %v957_v37 = vld [vmem:[#allocation9 + $0x170] sm:$0xff]  ;;  %v919_v61 = vld [vmem:[#allocation9 + $0x40] sm:$0xff] }
  0xb8   : > { %896 = vmatpush.msrb.mxu3 %v835_v38  ;;  %795 = vmatpush.msrb.mxu0 %v706_v47  ;;  %v958_v38 = vld [vmem:[#allocation9 + $0x178] sm:$0xff]  ;;  %v949_v47 = vld [vmem:[#allocation9 + $0x130] sm:$0xff] }
  0xb9   : > { %877 = vmatpush.msrb.mxu2 %v831_v41  ;;  %779 = vmatmul.f32.vlgmr.msra.gmra.mxu3 %v2543_v18  ;;  %v953_v41 = vld [vmem:[#allocation9 + $0x150] sm:$0xff] }
  0xba   : > { %897 = vmatpush.msrb.mxu3 %v832_v42  ;;  %796 = vmatpush.msrb.mxu0 %v703_v51  ;;  %v954_v42 = vld [vmem:[#allocation9 + $0x158] sm:$0xff]  ;;  %v944_v51 = vld [vmem:[#allocation9 + $0x108] sm:$0xff] }
  0xbb   : > { %878 = vmatpush.msrb.mxu2 %v828_v45  ;;  %v931_v45 = vld [vmem:[#allocation9 + $0xa0] sm:$0xff] }
  0xbc   : > { %898 = vmatpush.msrb.mxu3 %v829_v46  ;;  %797 = vmatpush.msrb.mxu0 %v700_v55  ;;  %v948_v46 = vld [vmem:[#allocation9 + $0x128] sm:$0xff]  ;;  %v923_v55 = vld [vmem:[#allocation9 + $0x60] sm:$0xff] }
  0xbd   : > { %879 = vmatpush.msrb.mxu2 %v825_v49  ;;  %v927_v49 = vld [vmem:[#allocation9 + $0x80] sm:$0xff] }
  0xbe   : > { %899 = vmatpush.msrb.mxu3 %v826_v50  ;;  %798 = vmatpush.msrb.mxu0 %v697_v60 }
  0xbf   : > { %880 = vmatpush.msrb.mxu2 %v822_v53  ;;  %v946_v53 = vld [vmem:[#allocation9 + $0x118] sm:$0xff]  ;;  %799 = vmatmul.f32.vlgmr.msrb.gmra.mxu0 %v2543_v18 }
  0xc0   : > { %900 = vmatpush.msrb.mxu3 %v823_v54  ;;  %975 = vmatpush.msra.mxu0 %v971_v0 }
  0xc1   : > { %881 = vmatpush.msrb.mxu2 %v819_v57  ;;  %v941_v57 = vld [vmem:[#allocation9 + $0xf0] sm:$0xff] }
  0xc2   : > { %901 = vmatpush.msrb.mxu3 %v820_v59  ;;  %976 = vmatpush.msra.mxu0 %v967_v4  ;;  %v942_v59 = vld [vmem:[#allocation9 + $0xf8] sm:$0xff] }
  0xc3   : > { %882 = vmatpush.msrb.mxu2 %v816_v62  ;;  %v936_v62 = vld [vmem:[#allocation9 + $0xc8] sm:$0xff] }
  0xc4   : > { %902 = vmatpush.msrb.mxu3 %v817_v63  ;;  %977 = vmatpush.msra.mxu0 %v963_v8  ;;  %v933_v8 = vld [vmem:[#allocation9 + $0xb0] sm:$0xff] }
  0xc5   : > { %759 = vmatmul.f32.vlgmr.msra.gmra.mxu2 %v2543_v18 }
  0xc6   : > { %903 = vmatpush.msrb.mxu3 %v814_v3  ;;  %978 = vmatpush.msra.mxu0 %v959_v14  ;;  %v911_v14 = vld [vmem:[#allocation9] sm:$0xff] }
  0xc8   : > { %904 = vmatpush.msrb.mxu3 %v811_v7  ;;  %979 = vmatpush.msra.mxu0 %v955_v19  ;;  %v932_v7 = vld [vmem:[#allocation9 + $0xa8] sm:$0xff] }
  0xca   : > { %905 = vmatpush.msrb.mxu3 %v808_v13 }
  0xcc   : > { %906 = vmatpush.msrb.mxu3 %v805_v17  ;;  %v930_v17 = vld [vmem:[#allocation9 + $0x98] sm:$0xff] }
  0xce   : > { %1035 = vmatpush.msra.mxu3 %v974_v22  ;;  %v925_v22 = vld [vmem:[#allocation9 + $0x70] sm:$0xff] }
 0x11c   : > { %v598_v9 = vpop.f32.mrf.mxu0 }
 0x11d   : > { %v664_v10 = vpop.f32.mrf.mxu1  ;;  %v2531_v11 = vadd.f32 %v598_v9, %v580_v1  ;;  %v812_v1 = vld [vmem:[#allocation8 + $0x48] sm:$0xff]  ;;  %v806_v9 = vld [vmem:[#allocation8 + $0x18] sm:$0xff] }
 0x11e   : > { %v2533_v12 = vadd.f32 %v664_v10, %v646_v2  ;;  %v813_v2 = vld [vmem:[#allocation8 + $0x50] sm:$0xff]  ;;  %863 = vmatpush.msrb.mxu1 %v812_v1  ;;  %v807_v10 = vld [vmem:[#allocation8 + $0x20] sm:$0xff] }
 0x11f   : > { %601 = vadd.xlane.f32.xlu0 %v2531_v11  ;;  %v604_v26 = vmul.f32 %v2531_v11, %v2531_v11  ;;  %883 = vmatpush.msrb.mxu2 %v813_v2  ;;  %v937_v1 = vld [vmem:[#allocation9 + $0xd0] sm:$0xff]  ;;  %v938_v2 = vld [vmem:[#allocation9 + $0xd8] sm:$0xff] }
 0x120   : > { %667 = vadd.xlane.f32.xlu1 %v2533_v12  ;;  %v670_v23 = vmul.f32 %v2533_v12, %v2533_v12  ;;  %864 = vmatpush.msrb.mxu1 %v809_v5 }
 0x121   : > { %884 = vmatpush.msrb.mxu2 %v810_v6  ;;  %v915_v6 = vld [vmem:[#allocation9 + $0x20] sm:$0xff] }
 0x122   : > { %865 = vmatpush.msrb.mxu1 %v806_v9  ;;  %v934_v9 = vld [vmem:[#allocation9 + $0xb8] sm:$0xff] }
 0x123   : > { %885 = vmatpush.msrb.mxu2 %v807_v10 }
 0x124   : > { %866 = vmatpush.msrb.mxu1 %v803_v15  ;;  %v928_v15 = vld [vmem:[#allocation9 + $0x88] sm:$0xff] }
 0x125   : > { %886 = vmatpush.msrb.mxu2 %v804_v16  ;;  %v929_v16 = vld [vmem:[#allocation9 + $0x90] sm:$0xff] }
 0x126   : > { %995 = vmatpush.msra.mxu1 %v972_v20 }
 0x127   : > { %605 = vadd.xlane.f32.xlu0 %v604_v26  ;;  %v970_v26 = vld [vmem:[#allocation9 + $0x1d8] sm:$0xff]  ;;  %1015 = vmatpush.msra.mxu2 %v973_v21  ;;  %v924_v21 = vld [vmem:[#allocation9 + $0x68] sm:$0xff] }
 0x128   : > { %671 = vadd.xlane.f32.xlu1 %v670_v23  ;;  %v951_v23 = vld [vmem:[#allocation9 + $0x140] sm:$0xff]  ;;  %996 = vmatpush.msra.mxu1 %v968_v24 }
 0x129   : > { %980 = vmatpush.msra.mxu0 %v951_v23  ;;  %1016 = vmatpush.msra.mxu2 %v969_v25  ;;  %v926_v23 = vld [vmem:[#allocation9 + $0x78] sm:$0xff] }
 0x12a   : > { %1036 = vmatpush.msra.mxu3 %v970_v26  ;;  %997 = vmatpush.msra.mxu1 %v964_v28  ;;  %v920_v26 = vld [vmem:[#allocation9 + $0x48] sm:$0xff]  ;;  %v922_v28 = vld [vmem:[#allocation9 + $0x58] sm:$0xff] }
 0x12b   : > { %981 = vmatpush.msra.mxu0 %v947_v27  ;;  %1017 = vmatpush.msra.mxu2 %v965_v29  ;;  %v921_v27 = vld [vmem:[#allocation9 + $0x50] sm:$0xff]  ;;  %v916_v29 = vld [vmem:[#allocation9 + $0x28] sm:$0xff] }
 0x12c   : > { %1037 = vmatpush.msra.mxu3 %v966_v30  ;;  %998 = vmatpush.msra.mxu1 %v960_v32  ;;  %v917_v30 = vld [vmem:[#allocation9 + $0x30] sm:$0xff]  ;;  %v912_v32 = vld [vmem:[#allocation9 + $0x8] sm:$0xff] }
 0x12d   : > { %982 = vmatpush.msra.mxu0 %v943_v31  ;;  %1018 = vmatpush.msra.mxu2 %v961_v33  ;;  %v918_v31 = vld [vmem:[#allocation9 + $0x38] sm:$0xff]  ;;  %v913_v33 = vld [vmem:[#allocation9 + $0x10] sm:$0xff] }
 0x12e   : > { %1038 = vmatpush.msra.mxu3 %v962_v34  ;;  %999 = vmatpush.msra.mxu1 %v956_v36  ;;  %v914_v34 = vld [vmem:[#allocation9 + $0x18] sm:$0xff] }
 0x12f   : > { %983 = vmatpush.msra.mxu0 %v939_v35  ;;  %1019 = vmatpush.msra.mxu2 %v957_v37 }
 0x130   : > { %1039 = vmatpush.msra.mxu3 %v958_v38  ;;  %1000 = vmatpush.msra.mxu1 %v952_v40 }
 0x131   : > { %984 = vmatpush.msra.mxu0 %v935_v39  ;;  %1020 = vmatpush.msra.mxu2 %v953_v41 }
 0x132   : > { %1040 = vmatpush.msra.mxu3 %v954_v42  ;;  %1001 = vmatpush.msra.mxu1 %v948_v46 }
 0x133   : > { %985 = vmatpush.msra.mxu0 %v931_v45  ;;  %1021 = vmatpush.msra.mxu2 %v949_v47 }
 0x134   : > { %1041 = vmatpush.msra.mxu3 %v950_v48  ;;  %1002 = vmatpush.msra.mxu1 %v944_v51 }
 0x135   : > { %986 = vmatpush.msra.mxu0 %v927_v49  ;;  %1022 = vmatpush.msra.mxu2 %v945_v52 }
 0x136   : > { %1042 = vmatpush.msra.mxu3 %v946_v53  ;;  %1003 = vmatpush.msra.mxu1 %v940_v56 }
 0x137   : > { %987 = vmatpush.msra.mxu0 %v923_v55  ;;  %1023 = vmatpush.msra.mxu2 %v941_v57 }
 0x138   : > { %1043 = vmatpush.msra.mxu3 %v942_v59  ;;  %1004 = vmatpush.msra.mxu1 %v936_v62 }
 0x139   : > { %988 = vmatpush.msra.mxu0 %v919_v61  ;;  %1024 = vmatpush.msra.mxu2 %v937_v1 }
 0x13a   : > { %1044 = vmatpush.msra.mxu3 %v938_v2  ;;  %1005 = vmatpush.msra.mxu1 %v932_v7  ;;  %v1057_v2 = vperm.slane %v2527_v58, 5 }
 0x13b   : > { %989 = vmatpush.msra.mxu0 %v915_v6  ;;  %1025 = vmatpush.msra.mxu2 %v933_v8 }
 0x13c   : > { %1045 = vmatpush.msra.mxu3 %v934_v9  ;;  %1006 = vmatpush.msra.mxu1 %v928_v15  ;;  %v1059_v15 = vperm.slane %v2527_v58, 6 }
 0x13d   : > { %990 = vmatpush.msra.mxu0 %v911_v14  ;;  %1026 = vmatpush.msra.mxu2 %v929_v16 }
 0x13e   : > { %1046 = vmatpush.msra.mxu3 %v930_v17  ;;  %1007 = vmatpush.msra.mxu1 %v924_v21 }
 0x13f   : > { %1027 = vmatpush.msra.mxu2 %v925_v22 }
 0x140   : > { %1047 = vmatpush.msra.mxu3 %v926_v23  ;;  %1008 = vmatpush.msra.mxu1 %v920_v26 }
 0x141   : > { %1028 = vmatpush.msra.mxu2 %v921_v27 }
 0x142   : > { %1048 = vmatpush.msra.mxu3 %v922_v28  ;;  %1009 = vmatpush.msra.mxu1 %v916_v29 }
 0x143   : > { %1029 = vmatpush.msra.mxu2 %v917_v30 }
 0x144   : > { %1049 = vmatpush.msra.mxu3 %v918_v31  ;;  %1010 = vmatpush.msra.mxu1 %v912_v32 }
 0x145   : > { %1030 = vmatpush.msra.mxu2 %v913_v33 }
 0x146   : > { %1050 = vmatpush.msra.mxu3 %v914_v34 }
 0x148   : > { %v760_v1 = vpop.f32.mrf.mxu2 }
 0x192   : > { %v602_v43 = vpop.xlane.xlu0 %601 }
 0x193   : > { %v668_v44 = vpop.xlane.xlu1 %667  ;;  %v2549_v54 = vmul.f32 0.03125, %v602_v43 }
 0x194   : > { %v2547_v50 = vmul.f32 0.03125, %v668_v44  ;;  %v2556_v44 = vld [vmem:[#allocation12] sm:$0xff] }
 0x195   : > { %v608_v3 = vmul.f32 %v2549_v54, %v2549_v54  ;;  %v611_v47 = vsub.f32 %v2531_v11, %v2549_v54  ;;  %v624_v49 = vperm.slane %v2556_v44, 0  ;;  %v690_v53 = vperm.slane %v2556_v44, 2 }
 0x196   : > { %v674_v60 = vmul.f32 %v2547_v50, %v2547_v50  ;;  %v677_v51 = vsub.f32 %v2533_v12, %v2547_v50  ;;  %v626_v57 = vperm.slane %v2556_v44, 1  ;;  %v2566_v12 = vpop.f32.mrf.mxu0  ;;  %v2568_v50 = vld [vmem:[#allocation11 + $0x8] sm:$0x1f] }
 0x197   : > { %v1120_v16 = vperm.slane %v2568_v50, 1  ;;  %v1178_v22 = vperm.slane %v2568_v50, 2 }
 0x19a   : > { %v606_v63 = vpop.xlane.xlu0 %605 }
 0x19b   : > { %v672_v0 = vpop.xlane.xlu1 %671  ;;  %v607_v4 = vmul.f32 0.03125, %v606_v63 }
 0x19c   : > { %v673_v5 = vmul.f32 0.03125, %v672_v0 }
 0x19d   : > { %v609_v10 = vsub.f32 %v607_v4, %v608_v3  ;;  %v1055_v3 = vperm.slane %v2527_v58, 2  ;;  %v1118_v4 = vperm.slane %v2568_v50, 0 }
 0x19e   : > { %v675_v13 = vsub.f32 %v673_v5, %v674_v60  ;;  %v692_v60 = vperm.slane %v2556_v44, 3  ;;  %v1116_v5 = vperm.slane %v2527_v58, 3 }
 0x19f   : > { %v610_v19 = vmax.f32 %v609_v10, 0.0  ;;  %v1056_v9 = vadd.f32 %v1055_v3, %v760_v1  ;;  %v780_v10 = vpop.f32.mrf.mxu3 }
 0x1a0   : > { %v676_v20 = vmax.f32 %v675_v13, 0.0  ;;  %v1117_v14 = vadd.f32 %v1116_v5, %v780_v10  ;;  %v1379_v5 = vld [vmem:[#allocation2 + $0x278] sm:$0xff]  ;;  %v1374_v10 = vld [vmem:[#allocation2 + $0x250] sm:$0xff] }
 0x1a1   : > { %v612_v24 = vadd.f32 1e-05, %v610_v19  ;;  %1380 = vmatpush.msrb.mxu0 %v1379_v5 }
 0x1a2   : > { %v678_v25 = vadd.f32 1e-05, %v676_v20 }
 0x1a3   : > { %1830 = vrsqrt.f32 %v612_v24  ;;  %vm619_vm3 = vweird.f32 %v612_v24 }
 0x1a4   : > { %1832 = vrsqrt.f32 %v678_v25  ;;  %vm685_vm0 = vweird.f32 %v678_v25 }
 0x1a9   : > { %v1831_v35 = vpop.eup %1830 }
 0x1aa   : > { %v1833_v36 = vpop.eup %1832  ;;  %v614_v37 = vmul.f32 %v1831_v35, %v612_v24  ;;  %vm620_vm2 = vweird.f32 %v1831_v35 }
 0x1ab   : > { %v680_v38 = vmul.f32 %v1833_v36, %v678_v25  ;;  %vm686_vm1 = vweird.f32 %v1833_v36  ;;  %vm621_vm5 = vmor %vm619_vm3, %vm620_vm2 }
 0x1ac   : > { %v615_v39 = vmul.f32 %v1831_v35, %v614_v37  ;;  %vm687_vm4 = vmor %vm685_vm0, %vm686_vm1 }
 0x1ad   : > { %v681_v40 = vmul.f32 %v1833_v36, %v680_v38 }
 0x1ae   : > { %v616_v41 = vmul.f32 0.5, %v615_v39  ;;  %v1254_v39 = vld [vmem:[#allocation2 + $0x178] sm:$0xff] }
 0x1af   : > { %v682_v42 = vmul.f32 0.5, %v681_v40  ;;  %v1253_v40 = vld [vmem:[#allocation2 + $0x170] sm:$0xff] }
 0x1b0   : > { %v617_v43 = vsub.f32 1.5, %v616_v41  ;;  %v1252_v41 = vld [vmem:[#allocation2 + $0x168] sm:$0xff] }
 0x1b1   : > { %v683_v45 = vsub.f32 1.5, %v682_v42  ;;  %v1251_v42 = vld [vmem:[#allocation2 + $0x160] sm:$0xff] }
 0x1b2   : > { %v618_v46 = vmul.f32 %v1831_v35, %v617_v43  ;;  %v1250_v43 = vld [vmem:[#allocation2 + $0x158] sm:$0xff] }
 0x1b3   : > { %v684_v48 = vmul.f32 %v1833_v36, %v683_v45  ;;  %v1249_v45 = vld [vmem:[#allocation2 + $0x150] sm:$0xff] }
 0x1b4   : > { %v622_v52 = vsel %vm621_vm5, %v1831_v35, %v618_v46 }
 0x1b5   : > { %v688_v55 = vsel %vm687_vm4, %v1833_v36, %v684_v48  ;;  %v623_v56 = vmul.f32 %v622_v52, %v611_v47  ;;  %v1248_v47 = vld [vmem:[#allocation2 + $0x148] sm:$0xff]  ;;  %v1247_v48 = vld [vmem:[#allocation2 + $0x140] sm:$0xff]  ;;  %v1245_v52 = vld [vmem:[#allocation2 + $0x130] sm:$0xff] }
 0x1b6   : > { %v689_v59 = vmul.f32 %v688_v55, %v677_v51  ;;  %v1246_v51 = vld [vmem:[#allocation2 + $0x138] sm:$0xff]  ;;  %v1180_v55 = vperm.slane %v2568_v50, 3 }
 0x1b7   : > { %v625_v61 = vmul.f32 %v624_v49, %v623_v56 }
 0x1b8   : > { %v691_v62 = vmul.f32 %v690_v53, %v689_v59  ;;  %v1244_v53 = vld [vmem:[#allocation2 + $0x128] sm:$0xff] }
 0x1b9   : > { %v627_v11 = vadd.f32 %v626_v57, %v625_v61  ;;  %v1243_v57 = vld [vmem:[#allocation2 + $0x120] sm:$0xff] }
 0x1ba   : > { %v693_v54 = vadd.f32 %v692_v60, %v691_v62  ;;  %v1242_v62 = vld [vmem:[#allocation2 + $0x118] sm:$0xff] }
 0x1bb   : > { %v628_v63 = vmax.f32 %v627_v11, 0.0 }
 0x1bc   : > { %v694_v0 = vmax.f32 %v693_v54, 0.0  ;;  %v1241_v54 = vld [vmem:[#allocation2 + $0x110] sm:$0xff] }
 0x1bd   : > { %867 = vmatmul.f32.vlgmr.msrb.gmra.mxu1 %v628_v63  ;;  %887 = vmatmul.f32.vlgmr.msrb.gmra.mxu2 %v628_v63 }
 0x1be   : > { %907 = vmatmul.f32.vlgmr.msrb.gmra.mxu3 %v628_v63  ;;  %991 = vmatmul.f32.vlgmr.msra.gmra.mxu0 %v694_v0  ;;  %v1176_v63 = vperm.slane %v2527_v58, 7 }
 0x1c5   : > { %1011 = vmatmul.f32.vlgmr.msra.gmra.mxu1 %v694_v0  ;;  %1031 = vmatmul.f32.vlgmr.msra.gmra.mxu2 %v694_v0 }
 0x1c6   : > { %1051 = vmatmul.f32.vlgmr.msra.gmra.mxu3 %v694_v0  ;;  %v1240_v0 = vld [vmem:[#allocation2 + $0x108] sm:$0xff] }
 0x23a   : > { %v868_v6 = vpop.f32.mrf.mxu1 }
 0x23b   : > { %v1058_v7 = vadd.f32 %v1057_v2, %v868_v6  ;;  %v992_v8 = vpop.f32.mrf.mxu0  ;;  %v1378_v6 = vld [vmem:[#allocation2 + $0x270] sm:$0xff] }
 0x23c   : > { %v1119_v13 = vadd.f32 %v1118_v4, %v992_v8  ;;  %v1239_v4 = vld [vmem:[#allocation2 + $0x100] sm:$0xff]  ;;  %1381 = vmatpush.msrb.mxu0 %v1378_v6 }
 0x23d   : > { %1076 = vmatpush.xpose.msrb.mxu1 %v1058_v7  ;;  %v1377_v7 = vld [vmem:[#allocation2 + $0x268] sm:$0xff]  ;;  %v1376_v8 = vld [vmem:[#allocation2 + $0x260] sm:$0xff] }
 0x23e   : > { %1137 = vmatpush.xpose.msrb.mxu2 %v1119_v13  ;;  %1382 = vmatpush.msrb.mxu0 %v1377_v7  ;;  %v1373_v13 = vld [vmem:[#allocation2 + $0x248] sm:$0xff]  ;;  %v1326_v6 = vld [vmem:[#allocation2 + $0x180] sm:$0xff] }
 0x240   : > { %v888_v17 = vpop.f32.mrf.mxu2  ;;  %1077 = vmatmul.f32.vlgmr.msrb.gmra.mxu1 %v1056_v9  ;;  %v1375_v9 = vld [vmem:[#allocation2 + $0x258] sm:$0xff]  ;;  %1383 = vmatpush.msrb.mxu0 %v1376_v8 }
 0x241   : > { %v1060_v19 = vadd.f32 %v1059_v15, %v888_v17  ;;  %1138 = vmatmul.f32.vlgmr.msrb.gmra.mxu2 %v1117_v14  ;;  %v908_v46 = vpop.f32.mrf.mxu3  ;;  %v1372_v14 = vld [vmem:[#allocation2 + $0x240] sm:$0xff]  ;;  %v1371_v15 = vld [vmem:[#allocation2 + $0x238] sm:$0xff]  ;;  %v1369_v17 = vld [vmem:[#allocation2 + $0x228] sm:$0xff] }
 0x242   : > { %v1012_v20 = vpop.f32.mrf.mxu1  ;;  %1255 = vmatpush.msra.mxu2 %v1254_v39  ;;  %v1177_v3 = vadd.f32 %v1176_v63, %v908_v46  ;;  %1384 = vmatpush.msrb.mxu0 %v1375_v9  ;;  %v1332_v63 = vld [vmem:[#allocation2 + $0x1b0] sm:$0xff] }
 0x243   : > { %v1121_v21 = vadd.f32 %v1120_v16, %v1012_v20  ;;  %1111 = vmatpush.msra.mxu1 %v1060_v19  ;;  %v1370_v16 = vld [vmem:[#allocation2 + $0x230] sm:$0xff]  ;;  %v1368_v19 = vld [vmem:[#allocation2 + $0x220] sm:$0xff] }
 0x244   : > { %1256 = vmatpush.msra.mxu2 %v1253_v40  ;;  %1385 = vmatpush.msrb.mxu0 %v1374_v10 }
 0x245   : > { %1171 = vmatpush.msrb.mxu3 %v1121_v21  ;;  %v1367_v21 = vld [vmem:[#allocation2 + $0x218] sm:$0xff] }
 0x246   : > { %1257 = vmatpush.msra.mxu2 %v1252_v41  ;;  %1386 = vmatpush.msrb.mxu0 %v1373_v13 }
 0x248   : > { %v1032_v23 = vpop.f32.mrf.mxu2  ;;  %1258 = vmatpush.msra.mxu2 %v1251_v42  ;;  %1387 = vmatpush.msrb.mxu0 %v1372_v14 }
 0x249   : > { %v1179_v24 = vadd.f32 %v1178_v22, %v1032_v23  ;;  %v1052_v56 = vpop.f32.mrf.mxu3  ;;  %v1366_v22 = vld [vmem:[#allocation2 + $0x210] sm:$0xff]  ;;  %v1365_v23 = vld [vmem:[#allocation2 + $0x208] sm:$0xff] }
 0x24a   : > { %1259 = vmatpush.msra.mxu2 %v1250_v43  ;;  %v1181_v11 = vadd.f32 %v1180_v55, %v1052_v56  ;;  %1388 = vmatpush.msrb.mxu0 %v1371_v15  ;;  %v1341_v55 = vld [vmem:[#allocation2 + $0x1f8] sm:$0xff]  ;;  %v1340_v56 = vld [vmem:[#allocation2 + $0x1f0] sm:$0xff] }
 0x24b   : > { %1197 = vmatpush.xpose.msrb.mxu1 %v1179_v24  ;;  %v1364_v24 = vld [vmem:[#allocation2 + $0x200] sm:$0xff]  ;;  %1343 = vmatpush.msra.mxu3 %v1341_v55 }
 0x24c   : > { %1260 = vmatpush.msra.mxu2 %v1249_v45  ;;  %1389 = vmatpush.msrb.mxu0 %v1370_v16 }
 0x24d   : > { %1344 = vmatpush.msra.mxu3 %v1340_v56 }
 0x24e   : > { %1261 = vmatpush.msra.mxu2 %v1248_v47  ;;  %1390 = vmatpush.msrb.mxu0 %v1369_v17 }
 0x250   : > { %1262 = vmatpush.msra.mxu2 %v1247_v48  ;;  %1391 = vmatpush.msrb.mxu0 %v1368_v19 }
 0x252   : > { %1263 = vmatpush.msra.mxu2 %v1246_v51  ;;  %1392 = vmatpush.msrb.mxu0 %v1367_v21 }
 0x254   : > { %1264 = vmatpush.msra.mxu2 %v1245_v52  ;;  %1393 = vmatpush.msrb.mxu0 %v1366_v22 }
 0x256   : > { %1265 = vmatpush.msra.mxu2 %v1244_v53  ;;  %1394 = vmatpush.msrb.mxu0 %v1365_v23 }
 0x258   : > { %1266 = vmatpush.msra.mxu2 %v1243_v57  ;;  %1395 = vmatpush.msrb.mxu0 %v1364_v24  ;;  %v1339_v57 = vld [vmem:[#allocation2 + $0x1e8] sm:$0xff] }
 0x259   : > { %1345 = vmatpush.msra.mxu3 %v1339_v57 }
 0x25a   : > { %1267 = vmatpush.msra.mxu2 %v1242_v62  ;;  %v1335_v62 = vld [vmem:[#allocation2 + $0x1c8] sm:$0xff] }
 0x25c   : > { %1268 = vmatpush.msra.mxu2 %v1241_v54  ;;  %v1333_v54 = vld [vmem:[#allocation2 + $0x1b8] sm:$0xff] }
 0x25e   : > { %1269 = vmatpush.msra.mxu2 %v1240_v0  ;;  %v1331_v0 = vld [vmem:[#allocation2 + $0x1a8] sm:$0xff] }
 0x260   : > { %1270 = vmatpush.msra.mxu2 %v1239_v4  ;;  %v1327_v4 = vld [vmem:[#allocation2 + $0x188] sm:$0xff] }
 0x2bd   : > { %v1078_v25 = vpop.f32.mrf.mxu1 }
 0x2be   : > { %v1082_v26 = vsel %vm1081_vm6, %v1078_v25, -inf }
 0x2bf   : > { %1083 = vmax.xlane.f32.xlu2 %v1082_v26 }
 0x2c4   : > { %v1139_v27 = vpop.f32.mrf.mxu2 }
 0x2c5   : > { %v1142_v28 = vsel %vm1081_vm6, %v1139_v27, -inf }
 0x2c6   : > { %1143 = vmax.xlane.f32.xlu0 %v1142_v28  ;;  %v1236_v28 = vperm.slane %v2527_v58, 4 }
 0x332   : > { %v1084_v29 = vpop.xlane.xlu2 %1083 }
 0x333   : > { %v1085_v30 = vsub.f32 %v1078_v25, %v1084_v29  ;;  %v1237_v29 = vadd.f32 %v1236_v28, %v2566_v12 }
 0x335   : > { %v1086_v31 = vmul.f32 1.442695, %v1085_v30 }
 0x337   : > { %1834 = vpow2.f32 %v1086_v31 }
 0x339   : > { %v1144_v32 = vpop.xlane.xlu0 %1143 }
 0x33a   : > { %v1145_v33 = vsub.f32 %v1139_v27, %v1144_v32 }
 0x33c   : > { %v1146_v34 = vmul.f32 1.442695, %v1145_v33 }
 0x33d   : > { %v1835_v35 = vpop.eup %1834 }
 0x33e   : > { %v1088_v36 = vsel %vm1081_vm6, %v1835_v35, 0.0  ;;  %1836 = vpow2.f32 %v1146_v34 }
 0x33f   : > { %1089 = vadd.xlane.f32.xlu2 %v1088_v36 }
 0x344   : > { %v1837_v37 = vpop.eup %1836 }
 0x345   : > { %v1148_v38 = vsel %vm1081_vm6, %v1837_v37, 0.0 }
 0x346   : > { %1149 = vadd.xlane.f32.xlu1 %v1148_v38 }
 0x3b2   : > { %v1090_v49 = vpop.xlane.xlu2 %1089 }
 0x3b3   : > { %1838 = vrcp.f32 %v1090_v49 }
 0x3b9   : > { %v1839_v59 = vpop.eup %1838  ;;  %v1150_v60 = vpop.xlane.xlu1 %1149 }
 0x3ba   : > { %v1092_v61 = vmul.f32 %v1839_v59, %v1835_v35  ;;  %1840 = vrcp.f32 %v1150_v60  ;;  %v1338_v59 = vld [vmem:[#allocation2 + $0x1e0] sm:$0xff]  ;;  %v1337_v60 = vld [vmem:[#allocation2 + $0x1d8] sm:$0xff] }
 0x3bb   : > { %1346 = vmatpush.msra.mxu3 %v1338_v59 }
 0x3bc   : > { %1686 = vmatmul.msk.f32.vlgmr.msra.gmra.mxu1 %vm1081_vm6, %v1092_v61  ;;  %v1336_v61 = vld [vmem:[#allocation2 + $0x1d0] sm:$0xff] }
 0x3bd   : > { %1231 = vmatpush.msra.mxu1 %v1181_v11  ;;  %1347 = vmatpush.msra.mxu3 %v1337_v60  ;;  %v1334_v11 = vld [vmem:[#allocation2 + $0x1c0] sm:$0xff] }
 0x3bf   : > { %1348 = vmatpush.msra.mxu3 %v1336_v61 }
 0x3c0   : > { %v1841_v1 = vpop.eup %1840 }
 0x3c1   : > { %v1152_v2 = vmul.f32 %v1841_v1, %v1837_v37  ;;  %1349 = vmatpush.msra.mxu3 %v1335_v62  ;;  %v1330_v1 = vld [vmem:[#allocation2 + $0x1a0] sm:$0xff] }
 0x3c3   : > { %1687 = vmatmul.msk.f32.vlgmr.msrb.gmra.mxu3 %vm1081_vm6, %v1152_v2  ;;  %v1329_v2 = vld [vmem:[#allocation2 + $0x198] sm:$0xff] }
 0x3c4   : > { %1198 = vmatmul.f32.vlgmr.msrb.gmra.mxu1 %v1177_v3  ;;  %1350 = vmatpush.msra.mxu3 %v1334_v11  ;;  %v1328_v3 = vld [vmem:[#allocation2 + $0x190] sm:$0xff] }
 0x3c6   : > { %1351 = vmatpush.msra.mxu3 %v1333_v54 }
 0x3c8   : > { %1352 = vmatpush.msra.mxu3 %v1332_v63 }
 0x3ca   : > { %1353 = vmatpush.msra.mxu3 %v1331_v0 }
 0x3cc   : > { %1354 = vmatpush.msra.mxu3 %v1330_v1 }
 0x3ce   : > { %1355 = vmatpush.msra.mxu3 %v1329_v2 }
 0x3d0   : > { %1356 = vmatpush.msra.mxu3 %v1328_v3 }
 0x3d2   : > { %1357 = vmatpush.msra.mxu3 %v1327_v4 }
 0x3d4   : > { %1358 = vmatpush.msra.mxu3 %v1326_v6  ;;  %v1446_v6 = vperm.slane %v2556_v44, 6 }
 0x439   : > { %v2585_v20 = vpop.f32.mrf.mxu1 }
 0x43a   : > { %1271 = vmatmul.f32.vlgmr.msra.gmra.mxu2 %v2585_v20  ;;  %v1295_v12 = vsub.f32 %v2543_v18, %v2585_v20 }
 0x441   : > { %v1199_v25 = vpop.f32.mrf.mxu1 }
 0x442   : > { %v1202_v26 = vsel %vm1081_vm6, %v1199_v25, -inf }
 0x443   : > { %1203 = vmax.xlane.f32.xlu1 %v1202_v26 }
 0x446   : > { %v2589_v27 = vpop.f32.mrf.mxu3 }
 0x447   : > { %1396 = vmatmul.f32.vlgmr.msrb.gmra.mxu0 %v2589_v27 }
 0x4b6   : > { %v1204_v37 = vpop.xlane.xlu1 %1203 }
 0x4b7   : > { %v1205_v40 = vsub.f32 %v1199_v25, %v1204_v37 }
 0x4b9   : > { %v1206_v45 = vmul.f32 1.442695, %v1205_v40 }
 0x4bd   : > { %v1272_v30 = vpop.f32.mrf.mxu2 }
 0x4be   : > { %v1275_v31 = vadd.f32 %v1272_v30, %v1237_v29  ;;  %v1321_v29 = vperm.slane %v2556_v44, 4 }
 0x4c0   : > { %v1689_v32 = vmul.f32 -1.442695, %v1275_v31 }
 0x4c2   : > { %1842 = vpow2.f32 %v1689_v32  ;;  %v1323_v32 = vperm.slane %v2556_v44, 5 }
 0x4c8   : > { %v1843_v33 = vpop.eup %1842 }
 0x4c9   : > { %v1279_v34 = vadd.f32 1.0, %v1843_v33 }
 0x4cb   : > { %1844 = vrcp.f32 %v1279_v34  ;;  %v1291_v39 = vand.u32 2147483648, %v1279_v34  ;;  %v1289_v42 = vand.u32 2147483647, %v1279_v34  ;;  %vm1285_vm8 = vweird.f32 %v1279_v34 }
 0x4cc   : > { %1846 = vpow2.f32 %v1206_v45 }
 0x4cd   : > { %v1292_v58 = vor.u32 1.1754944e-38, %v1291_v39  ;;  %vm1290_vm10 = vcmp.eq.f32.partialorder %v1289_v42, 8.507059e+37 }
 0x4d1   : > { %v1845_v35 = vpop.eup %1844 }
 0x4d2   : > { %v1281_v36 = vmul.f32 %v1845_v35, %v1279_v34  ;;  %vm1286_vm7 = vweird.f32 %v1845_v35  ;;  %v1847_v52 = vpop.eup %1846 }
 0x4d3   : > { %vm1287_vm9 = vmor %vm1285_vm8, %vm1286_vm7  ;;  %v1208_v53 = vsel %vm1081_vm6, %v1847_v52, 0.0 }
 0x4d4   : > { %v1282_v38 = vsub.f32 1.0, %v1281_v36 }
 0x4d6   : > { %v1283_v41 = vmul.f32 %v1845_v35, %v1282_v38  ;;  %v1397_v38 = vpop.f32.mrf.mxu0 }
 0x4d8   : > { %v1284_v43 = vadd.f32 %v1845_v35, %v1283_v41 }
 0x4da   : > { %v1288_v46 = vsel %vm1287_vm9, %v1845_v35, %v1284_v43  ;;  %v1342_v35 = vperm.slane %v2568_v50, 4 }
 0x4db   : > { %v1293_v47 = vsel %vm1290_vm10, %v1292_v58, %v1288_v46 }
 0x4dc   : > { %v1296_v48 = vmul.f32 %v1295_v12, %v1293_v47 }
 0x4de   : > { %v2597_v49 = vadd.f32 %v1296_v48, %v2585_v20 }
 0x4e0   : > { %1298 = vadd.xlane.f32.xlu2 %v2597_v49  ;;  %v1301_v51 = vmul.f32 %v2597_v49, %v2597_v49 }
 0x4e2   : > { %1302 = vadd.xlane.f32.xlu0 %v1301_v51 }
 0x4e8   : > { %1209 = vadd.xlane.f32.xlu2 %v1208_v53 }
 0x553   : > { %v1299_v5 = vpop.xlane.xlu2 %1298 }
 0x554   : > { %v1300_v7 = vmul.f32 0.03125, %v1299_v5 }
 0x555   : > { %v1303_v8 = vpop.xlane.xlu0 %1302 }
 0x556   : > { %v1305_v9 = vmul.f32 %v1300_v7, %v1300_v7  ;;  %v1304_v10 = vmul.f32 0.03125, %v1303_v8  ;;  %v1308_v28 = vsub.f32 %v2597_v49, %v1300_v7 }
 0x558   : > { %v1306_v13 = vsub.f32 %v1304_v10, %v1305_v9  ;;  %v1448_v9 = vperm.slane %v2556_v44, 7 }
 0x55a   : > { %v1307_v14 = vmax.f32 %v1306_v13, 0.0  ;;  %v1454_v13 = vstv %s1691_s26 }
 0x55b   : > { %v1210_v15 = vpop.xlane.xlu2 %1209 }
 0x55c   : > { %v1309_v16 = vadd.f32 1e-05, %v1307_v14  ;;  %1848 = vrcp.f32 %v1210_v15  ;;  %v1451_v14 = vstv %s1450_s11 }
 0x55e   : > { %1850 = vrsqrt.f32 %v1309_v16  ;;  %vm1316_vm12 = vweird.f32 %v1309_v16 }
 0x562   : > { %v1849_v17 = vpop.eup %1848 }
 0x563   : > { %v1212_v19 = vmul.f32 %v1849_v17, %v1847_v52  ;;  %v1458_v17 = vstv %s1692_s12 }
 0x564   : > { %v1851_v21 = vpop.eup %1850 }
 0x565   : > { %v1311_v22 = vmul.f32 %v1851_v21, %v1309_v16  ;;  %1688 = vmatmul.msk.f32.vlgmr.msra.gmra.mxu1 %vm1081_vm6, %v1212_v19  ;;  %vm1317_vm11 = vweird.f32 %v1851_v21  ;;  %v1455_v19 = vmul.f32 %v1454_v13, %v2585_v20 }
 0x566   : > { %vm1318_vm13 = vmor %vm1316_vm12, %vm1317_vm11 }
 0x567   : > { %v1312_v23 = vmul.f32 %v1851_v21, %v1311_v22 }
 0x569   : > { %v1313_v24 = vmul.f32 0.5, %v1312_v23 }
 0x56b   : > { %v1314_v25 = vsub.f32 1.5, %v1313_v24 }
 0x56d   : > { %v1315_v26 = vmul.f32 %v1851_v21, %v1314_v25 }
 0x56f   : > { %v1319_v30 = vsel %vm1318_vm13, %v1851_v21, %v1315_v26 }
 0x570   : > { %v1320_v31 = vmul.f32 %v1319_v30, %v1308_v28 }
 0x572   : > { %v1322_v33 = vmul.f32 %v1321_v29, %v1320_v31 }
 0x574   : > { %v1324_v34 = vadd.f32 %v1323_v32, %v1322_v33 }
 0x576   : > { %1359 = vmatmul.f32.vlgmr.msra.gmra.mxu3 %v1324_v34  ;;  %v1420_v51 = vsub.f32 %v1324_v34, %v2589_v27 }
 0x5e2   : > { %v1233_v16 = vpop.f32.mrf.mxu1 }
 0x5e3   : > { %v1459_v22 = vmul.f32 %v1458_v17, %v1233_v16 }
 0x5f9   : > { %v1360_v36 = vpop.f32.mrf.mxu3 }
 0x5fa   : > { %v1361_v37 = vadd.f32 %v1360_v36, %v1342_v35 }
 0x5fc   : > { %v1400_v39 = vadd.f32 %v1397_v38, %v1361_v37 }
 0x5fe   : > { %v1690_v40 = vmul.f32 -1.442695, %v1400_v39 }
 0x600   : > { %1852 = vpow2.f32 %v1690_v40 }
 0x606   : > { %v1853_v41 = vpop.eup %1852 }
 0x607   : > { %v1404_v42 = vadd.f32 1.0, %v1853_v41 }
 0x609   : > { %1854 = vrcp.f32 %v1404_v42  ;;  %v1416_v45 = vand.u32 2147483648, %v1404_v42  ;;  %v1414_v47 = vand.u32 2147483647, %v1404_v42  ;;  %vm1410_vm15 = vweird.f32 %v1404_v42 }
 0x60b   : > { %v1417_v50 = vor.u32 1.1754944e-38, %v1416_v45  ;;  %vm1415_vm1 = vcmp.eq.f32.partialorder %v1414_v47, 8.507059e+37 }
 0x60f   : > { %v1855_v43 = vpop.eup %1854 }
 0x610   : > { %v1406_v58 = vmul.f32 %v1855_v43, %v1404_v42  ;;  %vm1411_vm14 = vweird.f32 %v1855_v43 }
 0x611   : > { %vm1412_vm0 = vmor %vm1410_vm15, %vm1411_vm14 }
 0x612   : > { %v1407_v12 = vsub.f32 1.0, %v1406_v58 }
 0x614   : > { %v1408_v46 = vmul.f32 %v1855_v43, %v1407_v12 }
 0x616   : > { %v1409_v48 = vadd.f32 %v1855_v43, %v1408_v46 }
 0x618   : > { %v1413_v49 = vsel %vm1412_vm0, %v1855_v43, %v1409_v48 }
 0x619   : > { %v1418_v52 = vsel %vm1415_vm1, %v1417_v50, %v1413_v49 }
 0x61a   : > { %v1421_v53 = vmul.f32 %v1420_v51, %v1418_v52 }
 0x61c   : > { %v1422_v55 = vadd.f32 %v1421_v53, %v2589_v27 }
 0x61e   : > { %1423 = vadd.xlane.f32.xlu0 %v1422_v55  ;;  %v1426_v56 = vmul.f32 %v1422_v55, %v1422_v55 }
 0x620   : > { %1427 = vadd.xlane.f32.xlu1 %v1426_v56 }
 0x691   : > { %v1424_v57 = vpop.xlane.xlu0 %1423 }
 0x692   : > { %v1425_v59 = vmul.f32 0.03125, %v1424_v57 }
 0x693   : > { %v1428_v60 = vpop.xlane.xlu1 %1427 }
 0x694   : > { %v1430_v61 = vmul.f32 %v1425_v59, %v1425_v59  ;;  %v1429_v62 = vmul.f32 0.03125, %v1428_v60  ;;  %v1433_v5 = vsub.f32 %v1422_v55, %v1425_v59 }
 0x696   : > { %v1431_v11 = vsub.f32 %v1429_v62, %v1430_v61 }
 0x698   : > { %v1432_v54 = vmax.f32 %v1431_v11, 0.0 }
 0x69a   : > { %v1434_v63 = vadd.f32 1e-05, %v1432_v54 }
 0x69c   : > { %1856 = vrsqrt.f32 %v1434_v63  ;;  %vm1441_vm3 = vweird.f32 %v1434_v63 }
 0x6a2   : > { %v1857_v0 = vpop.eup %1856 }
 0x6a3   : > { %v1436_v1 = vmul.f32 %v1857_v0, %v1434_v63  ;;  %vm1442_vm2 = vweird.f32 %v1857_v0 }
 0x6a4   : > { %vm1443_vm4 = vmor %vm1441_vm3, %vm1442_vm2 }
 0x6a5   : > { %v1437_v2 = vmul.f32 %v1857_v0, %v1436_v1 }
 0x6a7   : > { %v1438_v3 = vmul.f32 0.5, %v1437_v2 }
 0x6a9   : > { %v1439_v4 = vsub.f32 1.5, %v1438_v3 }
 0x6ab   : > { %v1440_v27 = vmul.f32 %v1857_v0, %v1439_v4 }
 0x6ad   : > { %v1444_v7 = vsel %vm1443_vm4, %v1857_v0, %v1440_v27 }
 0x6ae   : > { %v1445_v8 = vmul.f32 %v1444_v7, %v1433_v5 }
 0x6b0   : > { %v1447_v10 = vmul.f32 %v1446_v6, %v1445_v8 }
 0x6b2   : > { %v1449_v15 = vadd.f32 %v1448_v9, %v1447_v10 }
 0x6b4   : > { %v1452_v21 = vmul.f32 %v1451_v14, %v1449_v15 }
 0x6b6   : > { %v1456_v23 = vadd.f32 %v1455_v19, %v1452_v21 }
 0x6b8   : > { %v1460_v44 = vadd.f32 %v1459_v22, %v1456_v23 }
 0x6ba   : > { %v1461_v24 = vadd.f32 %v1460_v44, %v2543_v18 }
 0x6bc   : > { %1462 = vst [vmem:[%s557_s17] sm:$0xff] %v1461_v24 }
 0x6bd   : > { %2170 = shalt.err (!%p2167_p10)
}
 0x6be   : > { %1731 = dma.vmem_to_hbm [thread:$0]  (%p2372_p0), %s1477_s24, 128, %s1479_s10, %s1464_s20  }
 0x6bf PF: > { %s2713_s29 = sld [smem:[#allocation26_spill]] }
 0x6c0   : > { %s2715_s27 = sld [smem:[#allocation28_spill]] }
 0x6c5   : > { %s1490_s26 = sand.u32 1, %s2713_s29  }
 0x6c6   : > { %p2716_p7 = scmp.ge.s32.totalorder %s2715_s27, 2  ;;  %s1491_s11 = scalar_lea.sflag [#allocation4], %s1490_s26 }
 0x6c8   : > { %p1766_p3 = pnand %p2716_p7, %p2378_p5 }
 0x6ca   : > { %p1767_p6 = pneg %p1766_p3 }
 0x6cc   : > { %2212 = dma.done.wait (%p1767_p6), %s1491_s11, 128  }
 0x6cd   : > { %2214 = vsyncadd (%p1767_p6), %s1491_s11, 4294967168  ;;  %s2717_s16 = sld [smem:[#allocation29_spill]]  ;;  %s2720_s13 = smov %s2221_s14 }
 0x6ce   : > { %s2718_s12 = sld [smem:[#allocation27_spill]] }
 0x6cf   : > { %s2719_s15 = sld [smem:[#allocation30_spill]] }
 0x6d3   : > { %p25_p11 = scmp.ge.s32.totalorder %s2717_s16, 4  }
 0x6d4   : > { %s2721_s14 = smov %s2718_s12 }
 0x6d5   :  { %27 = sbr.rel (!%p25_p11) target bundleno = 13 (0xd), region = 159 }
 0x6da   :  { %1497 = vsyncpa [#allocation3], 1 }
 0x6db   :  { %1499 = vsyncpa [#allocation3 + $0x1], 1 }
 0x6dc   :  { %1500 = vsyncpa [#allocation7], 1 }
 0x6dd   :  { %1501 = vsyncpa [#allocation10], 1 }
 0x6de   :  { %1502 = vsyncpa [#allocation13], 1 }
 0x6df   :  { %1503 = vsyncpa [#allocation4], 1 }
 0x6e0   :  { %1505 = vsyncpa [#allocation4 + $0x1], 1 }
 0x6e1   :  { %1506 = vsyncpa [#allocation5], 1 }
 0x6e2   :  { %1508 = vsyncpa [#allocation5 + $0x1], 1 }

</bundles_post_ra>
